<compile_context>
chip_gen: v7x
topology: tpu7x:2x2x1
jax: 0.10.0
libtpu: 0.0.40
codegen_flags: <defaults>
</compile_context>

<pallas_src>
import math
import functools

import numpy as np
import jax
import jax.numpy as jnp
from jax.experimental import pallas as pl
from jax.experimental.pallas import tpu as pltpu

# ---------------- configuration ("Options") ----------------
HIDDEN = 32                 # options.hidden_dim
HEADS = 4                   # options.num_attention_heads
HEAD_DIM = HIDDEN // HEADS
FFN = 4 * HIDDEN            # transformer feed-forward width
DEGREE = 2                  # product_symmetries.degree (two daughters)
NUM_EMBED_LAYERS = 2        # options.num_branch_embedding_layers
NUM_ENCODER_LAYERS = 1      # options.num_branch_encoder_layers
NUM_DETECTOR_LAYERS = 2     # options.num_detector_layers
COMBINATORIAL_SCALE = 1.0   # options.combinatorial_scale

_LOG_TINY = float(np.log(np.float32(1e-45)))   # matches torch's (mask + 1e-45).log() for mask==0
_NEG_BIG = -1e30                                # additive key-mask bias
_ROW_TARGET = 128                               # target rows (B_BLK * S) per grid step


def _gather_rows(val2d, row_indices):
    """Static row gather from a 2-D value (single slice when contiguous)."""
    n = len(row_indices)
    if n > 1 and row_indices == tuple(range(row_indices[0], row_indices[0] + n)):
        return val2d[row_indices[0]:row_indices[0] + n, :]
    parts = [val2d[r:r + 1, :] for r in row_indices]
    return parts[0] if n == 1 else jnp.concatenate(parts, axis=0)


def _full_spec(arr):
    """BlockSpec for a grid-invariant (weight / constant) input: full array every step."""
    nd = arr.ndim
    return pl.BlockSpec(tuple(arr.shape), lambda i, _n=nd: (0,) * _n)


# ---------------- fused per-batch-block Pallas kernel ----------------
def _fused_branch_decoder_kernel(
    # per-block activations / masks
    x_ref, seq_ref, padb_ref, cross_ref, seqsel_ref, diag_ref,
    # StackedEncoder weights (bf16 matmul weights, f32 biases / LN params)
    w_emb_ref, b_emb_ref,
    wqkv_ref, bqkv_ref, wo_ref, bo_ref,
    ln1g_ref, ln1b_ref, w1_ref, b1_ref, w2_ref, b2_ref, ln2g_ref, ln2b_ref,
    # detector (BranchLinear) weights
    wdet_ref, bdet_ref, wdeto_ref, bdeto_ref,
    # SymmetricAttentionSplit daughter weights (packed)
    wd_ref, bd_ref,
    # outputs (lane-dense slabs)
    assign_ref, misc_ref, daught_ref,
    *, B_BLK, T, TS, D, H, DH, sel_idx, scale, APAD, MISC_W):
    f32 = jnp.float32
    bf16 = jnp.bfloat16
    R = B_BLK * (T + 1)

    def layernorm(v, g, b):
        mean = jnp.mean(v, axis=-1, keepdims=True)
        var = jnp.mean(jnp.square(v - mean), axis=-1, keepdims=True)
        return (v - mean) * jax.lax.rsqrt(var + 1e-5) * g + b

    # Row layout within the block (token-first):
    #   rows [0, B_BLK)                 : learned particle tokens (one per event)
    #   rows [B_BLK + e*T, B_BLK+(e+1)T): jets of event e
    x = x_ref[...].astype(f32)            # [R, D]
    seq = seq_ref[...].astype(f32)        # [R, 1]   1.0 = real slot

    # Additive key bias (hoisted once): -1e30 on padded keys and cross-event keys.
    key_bias = cross_ref[...].astype(f32) + padb_ref[...].astype(f32)   # [R, R]

    # ---- StackedEncoder: embedding layers ----
    for l in range(w_emb_ref.shape[0]):
        x = jax.nn.gelu(jnp.dot(x.astype(bf16), w_emb_ref[l],
                                preferred_element_type=f32) + b_emb_ref[l]) * seq

    # per-head lane masks, built once (JAX does not CSE broadcast_in_dim)
    lane = jax.lax.broadcasted_iota(jnp.int32, (1, D), 1)
    head_masks = [jnp.logical_and(lane >= h * DH, lane < (h + 1) * DH) for h in range(H)]

    # ---- transformer encoder layers (1/sqrt(DH) already folded into Q weights) ----
    for l in range(wqkv_ref.shape[0]):
        qkv = jnp.dot(x.astype(bf16), wqkv_ref[l], preferred_element_type=f32) + bqkv_ref[l]
        q = qkv[:, 0:D]
        k = qkv[:, D:2 * D].astype(bf16)
        v = qkv[:, 2 * D:3 * D]
        attn = jnp.zeros((R, D), f32)
        for h in range(H):
            qh = jnp.where(head_masks[h], q, f32(0.0)).astype(bf16)   # zero non-head cols
            vh = jnp.where(head_masks[h], v, f32(0.0)).astype(bf16)
            s = jax.lax.dot_general(qh, k, (((1,), (1,)), ((), ())),
                                    preferred_element_type=f32) + key_bias     # [R, R]
            mx = jnp.max(s, axis=-1, keepdims=True)
            e = jnp.exp(s - mx)
            p = e * pl.reciprocal(jnp.sum(e, axis=-1, keepdims=True), approx=True)
            attn = attn + jnp.dot(p.astype(bf16), vh, preferred_element_type=f32)
        attn = jnp.dot(attn.astype(bf16), wo_ref[l], preferred_element_type=f32) + bo_ref[l]
        x = layernorm(x + attn, ln1g_ref[l], ln1b_ref[l]) * seq
        ff = jax.nn.gelu(jnp.dot(x.astype(bf16), w1_ref[l],
                                 preferred_element_type=f32) + b1_ref[l])
        ff = jnp.dot(ff.astype(bf16), w2_ref[l], preferred_element_type=f32) + b2_ref[l]
        x = layernorm(x + ff, ln2g_ref[l], ln2b_ref[l]) * seq

    # ---- daughter projections for every row (one dense, lane-friendly store) ----
    yd_all = (jnp.dot(x.astype(bf16), wd_ref[...], preferred_element_type=f32)
              + bd_ref[...].astype(f32)) * seq                                   # [R, 2D]
    daught_ref[...] = yd_all.astype(daught_ref.dtype)

    # ---- particle vectors (contiguous leading rows) + detection classifier ----
    particle = x[0:B_BLK, :]                                                     # [B_BLK, D]
    hdet = particle
    for l in range(wdet_ref.shape[0]):
        hdet = jax.nn.gelu(jnp.dot(hdet.astype(bf16), wdet_ref[l],
                                   preferred_element_type=f32) + bdet_ref[l])
    det = jnp.sum(hdet * wdeto_ref[...].astype(f32), axis=-1, keepdims=True) \
        + bdeto_ref[...].astype(f32)                                             # [B_BLK, 1]

    # pack particle + detection into one lane-dense (>=128 lane) output slab
    misc_parts = [particle, det]
    misc_pad = MISC_W - D - 1
    if misc_pad > 0:
        misc_parts.append(jnp.zeros((B_BLK, misc_pad), f32))
    misc_ref[...] = jnp.concatenate(misc_parts, axis=1).astype(misc_ref.dtype)

    # ---- degree-2 symmetric assignment + masked log-softmax per event ----
    diag = diag_ref[...].astype(f32)            # [TS, TS]  1.0 where allowed
    seqsel = seqsel_ref[...].astype(f32)        # [B_BLK, TS]
    out_rows = []
    for e in range(B_BLK):
        base = B_BLK + e * T
        rows = tuple(base + j for j in sel_idx)
        ysel = _gather_rows(yd_all, rows)       # [TS, 2D] selected daughter projections
        scol = _gather_rows(seq, rows)          # [TS, 1]
        y0 = ysel[:, 0:D].astype(jnp.bfloat16)
        y1 = ysel[:, D:2 * D].astype(jnp.bfloat16)
        a = jax.lax.dot_general(y0, y1, (((1,), (1,)), ((), ())),
                                preferred_element_type=f32) * f32(scale)         # [TS, TS]
        a = 0.5 * (a + jnp.transpose(a))        # symmetrize over {id, swap}

        srow = seqsel[e:e + 1, :]               # [1, TS]
        m = scol * srow * diag                  # padding outer-product & diagonal mask
        vlog = a + jnp.where(m > 0.5, f32(0.0), f32(_LOG_TINY))

        # flatten [TS, TS] -> [1, TS*TS] (lane-dense row), then masked log-softmax
        flat = jnp.concatenate([vlog[i:i + 1, :] for i in range(TS)], axis=1)
        mx = jnp.max(flat, axis=-1, keepdims=True)
        lse = mx + jnp.log(jnp.sum(jnp.exp(flat - mx), axis=-1, keepdims=True))
        row = flat - lse
        if APAD > TS * TS:
            row = jnp.concatenate([row, jnp.zeros((1, APAD - TS * TS), f32)], axis=1)
        out_rows.append(row)
    assign_ref[...] = jnp.concatenate(out_rows, axis=0).astype(assign_ref.dtype)


# ---------------- parameters ----------------
def init_params(key):
    def dense(k, din, dout):
        k1, k2 = jax.random.split(k)
        w = jax.random.normal(k1, (din, dout), jnp.float32) / math.sqrt(din)
        b = (jax.random.normal(k2, (dout,), jnp.float32) * 0.01).reshape(1, dout)
        return w, b

    keys = iter(jax.random.split(key, 64))
    p = {}
    p['particle_token'] = jax.random.normal(next(keys), (1, 1, HIDDEN), jnp.float32)

    ew, eb = zip(*[dense(next(keys), HIDDEN, HIDDEN) for _ in range(NUM_EMBED_LAYERS)])
    p['embed_w'], p['embed_b'] = jnp.stack(ew), jnp.stack(eb)

    wqkv, bqkv, wo, bo = [], [], [], []
    ln1g, ln1b, w1, b1, w2, b2, ln2g, ln2b = ([] for _ in range(8))
    for _ in range(NUM_ENCODER_LAYERS):
        q_w, q_b = dense(next(keys), HIDDEN, HIDDEN)
        k_w, k_b = dense(next(keys), HIDDEN, HIDDEN)
        v_w, v_b = dense(next(keys), HIDDEN, HIDDEN)
        wqkv.append(jnp.concatenate([q_w, k_w, v_w], axis=1))     # packed [D, 3D]
        bqkv.append(jnp.concatenate([q_b, k_b, v_b], axis=1))
        o_w, o_b = dense(next(keys), HIDDEN, HIDDEN)
        wo.append(o_w); bo.append(o_b)
        ln1g.append(jnp.ones((1, HIDDEN), jnp.float32)); ln1b.append(jnp.zeros((1, HIDDEN), jnp.float32))
        f1_w, f1_b = dense(next(keys), HIDDEN, FFN); w1.append(f1_w); b1.append(f1_b)
        f2_w, f2_b = dense(next(keys), FFN, HIDDEN); w2.append(f2_w); b2.append(f2_b)
        ln2g.append(jnp.ones((1, HIDDEN), jnp.float32)); ln2b.append(jnp.zeros((1, HIDDEN), jnp.float32))
    p['enc_wqkv'], p['enc_bqkv'] = jnp.stack(wqkv), jnp.stack(bqkv)
    p['enc_wo'], p['enc_bo'] = jnp.stack(wo), jnp.stack(bo)
    p['enc_ln1g'], p['enc_ln1b'] = jnp.stack(ln1g), jnp.stack(ln1b)
    p['enc_w1'], p['enc_b1'] = jnp.stack(w1), jnp.stack(b1)
    p['enc_w2'], p['enc_b2'] = jnp.stack(w2), jnp.stack(b2)
    p['enc_ln2g'], p['enc_ln2b'] = jnp.stack(ln2g), jnp.stack(ln2b)

    dw, db = zip(*[dense(next(keys), HIDDEN, HIDDEN) for _ in range(NUM_DETECTOR_LAYERS)])
    p['det_w'], p['det_b'] = jnp.stack(dw), jnp.stack(db)
    do_w, do_b = dense(next(keys), HIDDEN, 1)
    p['det_wo'] = do_w.T            # [1, HIDDEN]  row form -> VPU reduce inside the kernel
    p['det_bo'] = do_b              # [1, 1]

    d0_w, d0_b = dense(next(keys), HIDDEN, HIDDEN)
    d1_w, d1_b = dense(next(keys), HIDDEN, HIDDEN)
    p['daughter_w'] = jnp.concatenate([d0_w, d1_w], axis=1)       # packed [D, DEGREE*D]
    p['daughter_b'] = jnp.concatenate([d0_b, d1_b], axis=1)       # [1, DEGREE*D]
    return p


def prepare_params(params):
    """Kernel-ready params: bf16 MXU weights, f32 biases/LN, 1/sqrt(head_dim) folded into Q."""
    bf16 = jnp.bfloat16
    inv_sqrt_dh = 1.0 / math.sqrt(HEAD_DIM)
    qkv_scale = jnp.concatenate(
        [jnp.full((1, HIDDEN), inv_sqrt_dh, jnp.float32),
         jnp.ones((1, 2 * HIDDEN), jnp.float32)], axis=1)          # scale only the Q columns
    kp = dict(params)
    kp['embed_w'] = params['embed_w'].astype(bf16)
    kp['enc_wqkv'] = (params['enc_wqkv'] * qkv_scale).astype(bf16)
    kp['enc_bqkv'] = params['enc_bqkv'] * qkv_scale
    kp['enc_wo'] = params['enc_wo'].astype(bf16)
    kp['enc_w1'] = params['enc_w1'].astype(bf16)
    kp['enc_w2'] = params['enc_w2'].astype(bf16)
    kp['det_w'] = params['det_w'].astype(bf16)
    kp['daughter_w'] = params['daughter_w'].astype(bf16)
    return kp


# ---------------- BranchDecoder forward ----------------
def branch_decoder_forward(kparams, event_vectors, padding_mask, sequence_mask, global_mask):
    T, B, D = event_vectors.shape
    S = T + 1
    f32 = jnp.float32

    # TODO(synk): global_mask selection requires a concrete (non-traced) mask — Pallas needs static shapes.
    sel_idx = tuple(int(i) for i in np.nonzero(np.asarray(global_mask))[0])
    sel_np = np.asarray(sel_idx, dtype=np.int64)
    TS = len(sel_idx)

    # batch blocking: ~_ROW_TARGET rows per grid step, grid sharded across TensorCores
    B_BLK = max(1, min(B, _ROW_TARGET // S))
    NB = -(-B // B_BLK)
    B_pad = NB * B_BLK
    R = B_BLK * S

    # ---- glue: token-first batch-block layout ----
    ev_bm = jnp.transpose(event_vectors, (1, 0, 2)).astype(f32)            # [B, T, D]
    seq_bt = jnp.transpose(sequence_mask[:, :, 0]).astype(f32)             # [B, T]
    padk_bt = padding_mask.astype(f32)                                     # [B, T]
    if B_pad > B:
        ev_bm = jnp.concatenate([ev_bm, jnp.zeros((B_pad - B, T, D), f32)], 0)
        seq_bt = jnp.concatenate([seq_bt, jnp.zeros((B_pad - B, T), f32)], 0)
        padk_bt = jnp.concatenate([padk_bt, jnp.ones((B_pad - B, T), f32)], 0)

    jets = ev_bm.reshape(NB, B_BLK * T, D)
    tokens = jnp.broadcast_to(kparams['particle_token'].reshape(1, 1, D), (NB, B_BLK, D)).astype(f32)
    x_blocks = jnp.concatenate([tokens, jets], axis=1)                     # [NB, R, D]

    seq_blocks = jnp.concatenate(
        [jnp.ones((NB, B_BLK, 1), f32), seq_bt.reshape(NB, B_BLK * T, 1)], axis=1)   # [NB, R, 1]

    pad_bias = jnp.concatenate(
        [jnp.zeros((NB, B_BLK), f32), padk_bt.reshape(NB, B_BLK * T)], axis=1
    ).reshape(NB, 1, R) * jnp.float32(_NEG_BIG)                            # [NB, 1, R] additive

    # constant within-block cross-event bias (independent of total batch size)
    eid = np.concatenate([np.arange(B_BLK), np.repeat(np.arange(B_BLK), T)])
    cross_bias = jnp.asarray(
        np.where(eid[:, None] != eid[None, :], _NEG_BIG, 0.0).astype(np.float32))    # [R, R]

    seqsel_blocks = seq_bt[:, sel_np].reshape(NB, B_BLK, TS)               # [NB, B_BLK, TS]

    # constant diagonal-exclusion mask (data independent)
    identity = 1.0 - np.eye(TS, dtype=np.float32)
    dm = np.einsum('bi,bj->ij', identity, identity)
    diag_np = (dm < (TS + 1 - DEGREE)).astype(np.float32)
    diag = jnp.asarray(diag_np)                                            # [TS, TS]

    scale = COMBINATORIAL_SCALE / math.sqrt(float(D) ** DEGREE)            # weights_scale
    APAD = max(128, ((TS * TS + 127) // 128) * 128)                        # lane-dense assignment slab
    MISC_W = max(128, ((D + 1 + 127) // 128) * 128)                        # particle+detection slab

    kernel = functools.partial(
        _fused_branch_decoder_kernel,
        B_BLK=B_BLK, T=T, TS=TS, D=D, H=HEADS, DH=HEAD_DIM,
        sel_idx=sel_idx, scale=scale, APAD=APAD, MISC_W=MISC_W)

    data_inputs = (x_blocks, seq_blocks, pad_bias, cross_bias, seqsel_blocks, diag)
    weight_inputs = (
        kparams['embed_w'], kparams['embed_b'],
        kparams['enc_wqkv'], kparams['enc_bqkv'], kparams['enc_wo'], kparams['enc_bo'],
        kparams['enc_ln1g'], kparams['enc_ln1b'],
        kparams['enc_w1'], kparams['enc_b1'], kparams['enc_w2'], kparams['enc_b2'],
        kparams['enc_ln2g'], kparams['enc_ln2b'],
        kparams['det_w'], kparams['det_b'], kparams['det_wo'], kparams['det_bo'],
        kparams['daughter_w'], kparams['daughter_b'],
    )
    inputs = data_inputs + weight_inputs

    in_specs = [
        pl.BlockSpec((None, R, D), lambda i: (i, 0, 0)),
        pl.BlockSpec((None, R, 1), lambda i: (i, 0, 0)),
        pl.BlockSpec((None, 1, R), lambda i: (i, 0, 0)),
        pl.BlockSpec((R, R), lambda i: (0, 0)),
        pl.BlockSpec((None, B_BLK, TS), lambda i: (i, 0, 0)),
        pl.BlockSpec((TS, TS), lambda i: (0, 0)),
    ] + [_full_spec(w) for w in weight_inputs]

    out_shape = (
        jax.ShapeDtypeStruct((NB, B_BLK, APAD), jnp.float32),          # assignment slab
        jax.ShapeDtypeStruct((NB, B_BLK, MISC_W), jnp.float32),        # particle | detection slab
        jax.ShapeDtypeStruct((NB, R, DEGREE * D), jnp.float32),        # daughter projections (all rows)
    )
    out_specs = [
        pl.BlockSpec((None, B_BLK, APAD), lambda i: (i, 0, 0)),
        pl.BlockSpec((None, B_BLK, MISC_W), lambda i: (i, 0, 0)),
        pl.BlockSpec((None, R, DEGREE * D), lambda i: (i, 0, 0)),
    ]

    # rough cost estimate so XLA schedules neighbours sensibly around the custom call
    flops_blk = (
        2 * R * D * D * NUM_EMBED_LAYERS
        + NUM_ENCODER_LAYERS * (2 * R * D * 3 * D + HEADS * 4 * R * R * D
                                + 2 * R * D * D + 4 * R * D * FFN)
        + 2 * R * D * DEGREE * D
        + NUM_DETECTOR_LAYERS * 2 * B_BLK * D * D
        + B_BLK * 2 * TS * TS * D)
    trans_blk = (NUM_ENCODER_LAYERS * (HEADS * R * R + R * FFN)
                 + NUM_EMBED_LAYERS * R * D + B_BLK * TS * TS)
    bytes_acc = sum(int(a.size) * a.dtype.itemsize for a in inputs) \
        + sum(int(np.prod(o.shape)) * 4 for o in out_shape)
    cost = pl.CostEstimate(flops=int(NB * flops_blk),
                           transcendentals=int(NB * trans_blk),
                           bytes_accessed=int(bytes_acc))

    assign_blk, misc_blk, daught_blk = pl.pallas_call(
        kernel,
        out_shape=out_shape,
        grid_spec=pltpu.PrefetchScalarGridSpec(
            num_scalar_prefetch=0, grid=(NB,),
            in_specs=in_specs, out_specs=out_specs),
        compiler_params=pltpu.CompilerParams(dimension_semantics=("parallel",)),
        cost_estimate=cost,
    )(*inputs)

    # ---- unpack lane-dense slabs (trivial glue) ----
    assignment = assign_blk.reshape(B_pad, APAD)[:B, :TS * TS].reshape(B, TS, TS)
    misc = misc_blk.reshape(B_pad, MISC_W)[:B]
    particle_vector = misc[:, :D]
    detection = misc[:, D]

    daught_jets = daught_blk[:, B_BLK:, :].reshape(B_pad, T, DEGREE * D)[:B]
    daught_sel = daught_jets[:, sel_np, :]                                        # [B, TS, DEG*D]
    daughter_vectors = daught_sel.reshape(B, TS, DEGREE, D).transpose(2, 1, 0, 3)  # [deg, TS, B, D]

    # boolean assignment mask — identical to the in-kernel log-softmax mask, computed as glue
    seq_sel_b = seq_bt[:B, sel_np]                                                 # [B, TS]
    assignment_mask = (seq_sel_b[:, :, None] * seq_sel_b[:, None, :] * diag[None]) > 0.5

    return assignment, detection, assignment_mask, particle_vector, daughter_vectors


# ---------------- demo ----------------
if __name__ == "__main__":
    key = jax.random.PRNGKey(0)
    k_params, k_ev = jax.random.split(key)

    T, B = 8, 2
    params = init_params(k_params)
    kparams = prepare_params(params)
    event_vectors = jax.random.normal(k_ev, (T, B, HIDDEN), jnp.float32)

    lengths = jnp.array([8, 6], dtype=jnp.int32)                    # real jets per event
    t_idx = jnp.arange(T)
    padding_mask = t_idx[None, :] >= lengths[:, None]               # [B, T], True = padded
    sequence_mask = (~padding_mask).T[:, :, None]                   # [T, B, 1], True = real
    global_mask = jnp.ones((T,), dtype=bool)                        # all timesteps selected

    outs = branch_decoder_forward(kparams, event_vectors, padding_mask, sequence_mask, global_mask)
    for o in outs:
        jax.block_until_ready(o)

    assignment, detection, assignment_mask, particle_vector, daughter_vectors = outs
    assert assignment.shape == (B, T, T)
    assert detection.shape == (B,)
    assert assignment_mask.shape == (B, T, T)
    assert particle_vector.shape == (B, HIDDEN)
    assert daughter_vectors.shape == (DEGREE, T, B, HIDDEN)
    assert bool(jnp.all(jnp.isfinite(assignment)))
    assert bool(jnp.all(jnp.isfinite(detection)))
    assert bool(jnp.all(jnp.isfinite(daughter_vectors)))
    print("KERNEL_OK")
</pallas_src>

<mosaic_0001>
module attributes {stable_mosaic.version = 11 : i64} {
  func.func @_fused_branch_decoder_kernel(%arg0: i32, %arg1: memref<1x18x32xf32, #tpu.memory_space<vmem>>, %arg2: memref<1x18x1xf32, #tpu.memory_space<vmem>>, %arg3: memref<1x1x18xf32, #tpu.memory_space<vmem>>, %arg4: memref<18x18xf32, #tpu.memory_space<vmem>>, %arg5: memref<1x2x8xf32, #tpu.memory_space<vmem>>, %arg6: memref<8x8xf32, #tpu.memory_space<vmem>>, %arg7: memref<2x32x32xbf16, #tpu.memory_space<vmem>>, %arg8: memref<2x1x32xf32, #tpu.memory_space<vmem>>, %arg9: memref<1x32x96xbf16, #tpu.memory_space<vmem>>, %arg10: memref<1x1x96xf32, #tpu.memory_space<vmem>>, %arg11: memref<1x32x32xbf16, #tpu.memory_space<vmem>>, %arg12: memref<1x1x32xf32, #tpu.memory_space<vmem>>, %arg13: memref<1x1x32xf32, #tpu.memory_space<vmem>>, %arg14: memref<1x1x32xf32, #tpu.memory_space<vmem>>, %arg15: memref<1x32x128xbf16, #tpu.memory_space<vmem>>, %arg16: memref<1x1x128xf32, #tpu.memory_space<vmem>>, %arg17: memref<1x128x32xbf16, #tpu.memory_space<vmem>>, %arg18: memref<1x1x32xf32, #tpu.memory_space<vmem>>, %arg19: memref<1x1x32xf32, #tpu.memory_space<vmem>>, %arg20: memref<1x1x32xf32, #tpu.memory_space<vmem>>, %arg21: memref<2x32x32xbf16, #tpu.memory_space<vmem>>, %arg22: memref<2x1x32xf32, #tpu.memory_space<vmem>>, %arg23: memref<1x32xf32, #tpu.memory_space<vmem>>, %arg24: memref<1x1xf32, #tpu.memory_space<vmem>>, %arg25: memref<32x64xbf16, #tpu.memory_space<vmem>>, %arg26: memref<1x64xf32, #tpu.memory_space<vmem>>, %arg27: memref<1x2x128xf32, #tpu.memory_space<vmem>>, %arg28: memref<1x2x128xf32, #tpu.memory_space<vmem>>, %arg29: memref<1x18x64xf32, #tpu.memory_space<vmem>>) attributes {dimension_semantics = [#tpu.dimension_semantics<parallel>], iteration_bounds = array<i64: 1>, scalar_prefetch = 0 : i64, scratch_operands = 0 : i64, tpu.core_type = #tpu.core_type<tc>, window_params = [{transform_indices = @transform_0, window_bounds = array<i64: 1, 18, 32>}, {transform_indices = @transform_1, window_bounds = array<i64: 1, 18, 1>}, {transform_indices = @transform_2, window_bounds = array<i64: 1, 1, 18>}, {pipeline_mode = #tpu.pipeline_mode<synchronous>, transform_indices = @transform_3, window_bounds = array<i64: 18, 18>}, {transform_indices = @transform_4, window_bounds = array<i64: 1, 2, 8>}, {pipeline_mode = #tpu.pipeline_mode<synchronous>, transform_indices = @transform_5, window_bounds = array<i64: 8, 8>}, {pipeline_mode = #tpu.pipeline_mode<synchronous>, transform_indices = @transform_6, window_bounds = array<i64: 2, 32, 32>}, {pipeline_mode = #tpu.pipeline_mode<synchronous>, transform_indices = @transform_7, window_bounds = array<i64: 2, 1, 32>}, {pipeline_mode = #tpu.pipeline_mode<synchronous>, transform_indices = @transform_8, window_bounds = array<i64: 1, 32, 96>}, {pipeline_mode = #tpu.pipeline_mode<synchronous>, transform_indices = @transform_9, window_bounds = array<i64: 1, 1, 96>}, {pipeline_mode = #tpu.pipeline_mode<synchronous>, transform_indices = @transform_10, window_bounds = array<i64: 1, 32, 32>}, {pipeline_mode = #tpu.pipeline_mode<synchronous>, transform_indices = @transform_11, window_bounds = array<i64: 1, 1, 32>}, {pipeline_mode = #tpu.pipeline_mode<synchronous>, transform_indices = @transform_12, window_bounds = array<i64: 1, 1, 32>}, {pipeline_mode = #tpu.pipeline_mode<synchronous>, transform_indices = @transform_13, window_bounds = array<i64: 1, 1, 32>}, {pipeline_mode = #tpu.pipeline_mode<synchronous>, transform_indices = @transform_14, window_bounds = array<i64: 1, 32, 128>}, {pipeline_mode = #tpu.pipeline_mode<synchronous>, transform_indices = @transform_15, window_bounds = array<i64: 1, 1, 128>}, {pipeline_mode = #tpu.pipeline_mode<synchronous>, transform_indices = @transform_16, window_bounds = array<i64: 1, 128, 32>}, {pipeline_mode = #tpu.pipeline_mode<synchronous>, transform_indices = @transform_17, window_bounds = array<i64: 1, 1, 32>}, {pipeline_mode = #tpu.pipeline_mode<synchronous>, transform_indices = @transform_18, window_bounds = array<i64: 1, 1, 32>}, {pipeline_mode = #tpu.pipeline_mode<synchronous>, transform_indices = @transform_19, window_bounds = array<i64: 1, 1, 32>}, {pipeline_mode = #tpu.pipeline_mode<synchronous>, transform_indices = @transform_20, window_bounds = array<i64: 2, 32, 32>}, {pipeline_mode = #tpu.pipeline_mode<synchronous>, transform_indices = @transform_21, window_bounds = array<i64: 2, 1, 32>}, {pipeline_mode = #tpu.pipeline_mode<synchronous>, transform_indices = @transform_22, window_bounds = array<i64: 1, 32>}, {pipeline_mode = #tpu.pipeline_mode<synchronous>, transform_indices = @transform_23, window_bounds = array<i64: 1, 1>}, {pipeline_mode = #tpu.pipeline_mode<synchronous>, transform_indices = @transform_24, window_bounds = array<i64: 32, 64>}, {pipeline_mode = #tpu.pipeline_mode<synchronous>, transform_indices = @transform_25, window_bounds = array<i64: 1, 64>}, {transform_indices = @transform_26, window_bounds = array<i64: 1, 2, 128>}, {transform_indices = @transform_27, window_bounds = array<i64: 1, 2, 128>}, {transform_indices = @transform_28, window_bounds = array<i64: 1, 18, 64>}]} {
    %c0 = arith.constant 0 : index
    %c0_0 = arith.constant 0 : index
    %c0_1 = arith.constant 0 : index
    %0 = vector.load %arg1[%c0, %c0_0, %c0_1] : memref<1x18x32xf32, #tpu.memory_space<vmem>>, vector<1x18x32xf32>
    %1 = vector.shape_cast %0 : vector<1x18x32xf32> to vector<18x32xf32>
    %c0_2 = arith.constant 0 : index
    %c0_3 = arith.constant 0 : index
    %c0_4 = arith.constant 0 : index
    %2 = vector.load %arg2[%c0_2, %c0_3, %c0_4] : memref<1x18x1xf32, #tpu.memory_space<vmem>>, vector<1x18x1xf32>
    %3 = vector.shape_cast %2 : vector<1x18x1xf32> to vector<18x1xf32>
    %c0_5 = arith.constant 0 : index
    %c0_6 = arith.constant 0 : index
    %4 = vector.load %arg4[%c0_5, %c0_6] : memref<18x18xf32, #tpu.memory_space<vmem>>, vector<18x18xf32>
    %c0_7 = arith.constant 0 : index
    %c0_8 = arith.constant 0 : index
    %c0_9 = arith.constant 0 : index
    %5 = vector.load %arg3[%c0_7, %c0_8, %c0_9] : memref<1x1x18xf32, #tpu.memory_space<vmem>>, vector<1x1x18xf32>
    %6 = vector.shape_cast %5 : vector<1x1x18xf32> to vector<1x18xf32>
    %7 = vector.broadcast %6 : vector<1x18xf32> to vector<18x18xf32>
    %8 = arith.addf %4, %7 : vector<18x18xf32>
    %9 = arith.truncf %1 : vector<18x32xf32> to vector<18x32xbf16>
    %c0_10 = arith.constant 0 : index
    %c0_11 = arith.constant 0 : index
    %c0_12 = arith.constant 0 : index
    %10 = vector.load %arg7[%c0_10, %c0_11, %c0_12] : memref<2x32x32xbf16, #tpu.memory_space<vmem>>, vector<1x32x32xbf16>
    %11 = vector.shape_cast %10 : vector<1x32x32xbf16> to vector<32x32xbf16>
    %cst = arith.constant dense<0.000000e+00> : vector<18x32xf32>
    %12 = tpu.matmul %9, %11, %cst {dimension_numbers = #tpu.dot_dimension_numbers<[1], [0], [0], [1], [0, 0, 1, 1], [], []>} : vector<18x32xbf16>, vector<32x32xbf16>, vector<18x32xf32> -> vector<18x32xf32>
    %c0_13 = arith.constant 0 : index
    %c0_14 = arith.constant 0 : index
    %c0_15 = arith.constant 0 : index
    %13 = vector.load %arg8[%c0_13, %c0_14, %c0_15] : memref<2x1x32xf32, #tpu.memory_space<vmem>>, vector<1x1x32xf32>
    %14 = vector.shape_cast %13 : vector<1x1x32xf32> to vector<1x32xf32>
    %15 = vector.broadcast %14 : vector<1x32xf32> to vector<18x32xf32>
    %16 = arith.addf %12, %15 : vector<18x32xf32>
    %17 = arith.mulf %16, %16 : vector<18x32xf32>
    %18 = arith.mulf %16, %17 : vector<18x32xf32>
    %cst_16 = arith.constant 4.471500e-02 : f32
    %19 = vector.broadcast %cst_16 : f32 to vector<18x32xf32>
    %20 = arith.mulf %19, %18 : vector<18x32xf32>
    %21 = arith.addf %16, %20 : vector<18x32xf32>
    %cst_17 = arith.constant 0.797884583 : f32
    %22 = vector.broadcast %cst_17 : f32 to vector<18x32xf32>
    %23 = arith.mulf %22, %21 : vector<18x32xf32>
    %24 = math.tanh %23 : vector<18x32xf32>
    %cst_18 = arith.constant 1.000000e+00 : f32
    %25 = vector.broadcast %cst_18 : f32 to vector<18x32xf32>
    %26 = arith.addf %25, %24 : vector<18x32xf32>
    %cst_19 = arith.constant 5.000000e-01 : f32
    %27 = vector.broadcast %cst_19 : f32 to vector<18x32xf32>
    %28 = arith.mulf %27, %26 : vector<18x32xf32>
    %29 = arith.mulf %16, %28 : vector<18x32xf32>
    %30 = vector.broadcast %3 : vector<18x1xf32> to vector<18x32xf32>
    %31 = arith.mulf %29, %30 : vector<18x32xf32>
    %32 = arith.truncf %31 : vector<18x32xf32> to vector<18x32xbf16>
    %c1 = arith.constant 1 : index
    %c0_20 = arith.constant 0 : index
    %c0_21 = arith.constant 0 : index
    %33 = vector.load %arg7[%c1, %c0_20, %c0_21] : memref<2x32x32xbf16, #tpu.memory_space<vmem>>, vector<1x32x32xbf16>
    %34 = vector.shape_cast %33 : vector<1x32x32xbf16> to vector<32x32xbf16>
    %cst_22 = arith.constant dense<0.000000e+00> : vector<18x32xf32>
    %35 = tpu.matmul %32, %34, %cst_22 {dimension_numbers = #tpu.dot_dimension_numbers<[1], [0], [0], [1], [0, 0, 1, 1], [], []>} : vector<18x32xbf16>, vector<32x32xbf16>, vector<18x32xf32> -> vector<18x32xf32>
    %c1_23 = arith.constant 1 : index
    %c0_24 = arith.constant 0 : index
    %c0_25 = arith.constant 0 : index
    %36 = vector.load %arg8[%c1_23, %c0_24, %c0_25] : memref<2x1x32xf32, #tpu.memory_space<vmem>>, vector<1x1x32xf32>
    %37 = vector.shape_cast %36 : vector<1x1x32xf32> to vector<1x32xf32>
    %38 = vector.broadcast %37 : vector<1x32xf32> to vector<18x32xf32>
    %39 = arith.addf %35, %38 : vector<18x32xf32>
    %40 = arith.mulf %39, %39 : vector<18x32xf32>
    %41 = arith.mulf %39, %40 : vector<18x32xf32>
    %cst_26 = arith.constant 4.471500e-02 : f32
    %42 = vector.broadcast %cst_26 : f32 to vector<18x32xf32>
    %43 = arith.mulf %42, %41 : vector<18x32xf32>
    %44 = arith.addf %39, %43 : vector<18x32xf32>
    %cst_27 = arith.constant 0.797884583 : f32
    %45 = vector.broadcast %cst_27 : f32 to vector<18x32xf32>
    %46 = arith.mulf %45, %44 : vector<18x32xf32>
    %47 = math.tanh %46 : vector<18x32xf32>
    %cst_28 = arith.constant 1.000000e+00 : f32
    %48 = vector.broadcast %cst_28 : f32 to vector<18x32xf32>
    %49 = arith.addf %48, %47 : vector<18x32xf32>
    %cst_29 = arith.constant 5.000000e-01 : f32
    %50 = vector.broadcast %cst_29 : f32 to vector<18x32xf32>
    %51 = arith.mulf %50, %49 : vector<18x32xf32>
    %52 = arith.mulf %39, %51 : vector<18x32xf32>
    %53 = vector.broadcast %3 : vector<18x1xf32> to vector<18x32xf32>
    %54 = arith.mulf %52, %53 : vector<18x32xf32>
    %55 = tpu.iota {dimensions = array<i32: 1>} : vector<1x32xi32>
    %c0_i32 = arith.constant 0 : i32
    %56 = vector.broadcast %c0_i32 : i32 to vector<1x32xi32>
    %57 = arith.cmpi sge, %55, %56 : vector<1x32xi32>
    %c8_i32 = arith.constant 8 : i32
    %58 = vector.broadcast %c8_i32 : i32 to vector<1x32xi32>
    %59 = arith.cmpi slt, %55, %58 : vector<1x32xi32>
    %60 = arith.andi %57, %59 : vector<1x32xi1>
    %c8_i32_30 = arith.constant 8 : i32
    %61 = vector.broadcast %c8_i32_30 : i32 to vector<1x32xi32>
    %62 = arith.cmpi sge, %55, %61 : vector<1x32xi32>
    %c16_i32 = arith.constant 16 : i32
    %63 = vector.broadcast %c16_i32 : i32 to vector<1x32xi32>
    %64 = arith.cmpi slt, %55, %63 : vector<1x32xi32>
    %65 = arith.andi %62, %64 : vector<1x32xi1>
    %c16_i32_31 = arith.constant 16 : i32
    %66 = vector.broadcast %c16_i32_31 : i32 to vector<1x32xi32>
    %67 = arith.cmpi sge, %55, %66 : vector<1x32xi32>
    %c24_i32 = arith.constant 24 : i32
    %68 = vector.broadcast %c24_i32 : i32 to vector<1x32xi32>
    %69 = arith.cmpi slt, %55, %68 : vector<1x32xi32>
    %70 = arith.andi %67, %69 : vector<1x32xi1>
    %c24_i32_32 = arith.constant 24 : i32
    %71 = vector.broadcast %c24_i32_32 : i32 to vector<1x32xi32>
    %72 = arith.cmpi sge, %55, %71 : vector<1x32xi32>
    %c32_i32 = arith.constant 32 : i32
    %73 = vector.broadcast %c32_i32 : i32 to vector<1x32xi32>
    %74 = arith.cmpi slt, %55, %73 : vector<1x32xi32>
    %75 = arith.andi %72, %74 : vector<1x32xi1>
    %76 = arith.truncf %54 : vector<18x32xf32> to vector<18x32xbf16>
    %c0_33 = arith.constant 0 : index
    %c0_34 = arith.constant 0 : index
    %c0_35 = arith.constant 0 : index
    %77 = vector.load %arg9[%c0_33, %c0_34, %c0_35] : memref<1x32x96xbf16, #tpu.memory_space<vmem>>, vector<1x32x96xbf16>
    %78 = vector.shape_cast %77 : vector<1x32x96xbf16> to vector<32x96xbf16>
    %cst_36 = arith.constant dense<0.000000e+00> : vector<18x96xf32>
    %79 = tpu.matmul %76, %78, %cst_36 {dimension_numbers = #tpu.dot_dimension_numbers<[1], [0], [0], [1], [0, 0, 1, 1], [], []>} : vector<18x32xbf16>, vector<32x96xbf16>, vector<18x96xf32> -> vector<18x96xf32>
    %c0_37 = arith.constant 0 : index
    %c0_38 = arith.constant 0 : index
    %c0_39 = arith.constant 0 : index
    %80 = vector.load %arg10[%c0_37, %c0_38, %c0_39] : memref<1x1x96xf32, #tpu.memory_space<vmem>>, vector<1x1x96xf32>
    %81 = vector.shape_cast %80 : vector<1x1x96xf32> to vector<1x96xf32>
    %82 = vector.broadcast %81 : vector<1x96xf32> to vector<18x96xf32>
    %83 = arith.addf %79, %82 : vector<18x96xf32>
    %84 = vector.extract_strided_slice %83 {offsets = [0, 0], sizes = [18, 32], strides = [1, 1]} : vector<18x96xf32> to vector<18x32xf32>
    %85 = vector.extract_strided_slice %83 {offsets = [0, 32], sizes = [18, 32], strides = [1, 1]} : vector<18x96xf32> to vector<18x32xf32>
    %86 = arith.truncf %85 : vector<18x32xf32> to vector<18x32xbf16>
    %87 = vector.extract_strided_slice %83 {offsets = [0, 64], sizes = [18, 32], strides = [1, 1]} : vector<18x96xf32> to vector<18x32xf32>
    %cst_40 = arith.constant 0.000000e+00 : f32
    %88 = vector.broadcast %cst_40 : f32 to vector<18x32xf32>
    %cst_41 = arith.constant 0.000000e+00 : f32
    %89 = vector.shape_cast %60 : vector<1x32xi1> to vector<1x32xi1>
    %90 = vector.broadcast %89 : vector<1x32xi1> to vector<18x32xi1>
    %91 = vector.broadcast %cst_41 : f32 to vector<18x32xf32>
    %92 = arith.select %90, %84, %91 : vector<18x32xi1>, vector<18x32xf32>
    %93 = arith.truncf %92 : vector<18x32xf32> to vector<18x32xbf16>
    %cst_42 = arith.constant 0.000000e+00 : f32
    %94 = vector.shape_cast %60 : vector<1x32xi1> to vector<1x32xi1>
    %95 = vector.broadcast %94 : vector<1x32xi1> to vector<18x32xi1>
    %96 = vector.broadcast %cst_42 : f32 to vector<18x32xf32>
    %97 = arith.select %95, %87, %96 : vector<18x32xi1>, vector<18x32xf32>
    %98 = arith.truncf %97 : vector<18x32xf32> to vector<18x32xbf16>
    %cst_43 = arith.constant dense<0.000000e+00> : vector<18x18xf32>
    %99 = tpu.matmul %93, %86, %cst_43 {dimension_numbers = #tpu.dot_dimension_numbers<[1], [1], [0], [0], [0, 0, 1, 0], [], []>} : vector<18x32xbf16>, vector<18x32xbf16>, vector<18x18xf32> -> vector<18x18xf32>
    %100 = arith.addf %99, %8 : vector<18x18xf32>
    %cst_44 = arith.constant dense<0xFF800000> : vector<18xf32>
    %101 = vector.multi_reduction <maximumf>, %100, %cst_44 [1] : vector<18x18xf32> to vector<18xf32>
    %102 = vector.shape_cast %101 : vector<18xf32> to vector<18x1xf32>
    %103 = vector.broadcast %102 : vector<18x1xf32> to vector<18x18xf32>
    %104 = arith.subf %100, %103 : vector<18x18xf32>
    %105 = math.exp %104 : vector<18x18xf32>
    %cst_45 = arith.constant dense<0.000000e+00> : vector<18xf32>
    %106 = vector.multi_reduction <add>, %105, %cst_45 [1] : vector<18x18xf32> to vector<18xf32>
    %107 = vector.shape_cast %106 : vector<18xf32> to vector<18x1xf32>
    %108 = tpu.reciprocal %107 {approx = true} : vector<18x1xf32> -> vector<18x1xf32>
    %109 = vector.broadcast %108 : vector<18x1xf32> to vector<18x18xf32>
    %110 = arith.mulf %105, %109 : vector<18x18xf32>
    %111 = arith.truncf %110 : vector<18x18xf32> to vector<18x18xbf16>
    %cst_46 = arith.constant dense<0.000000e+00> : vector<18x32xf32>
    %112 = tpu.matmul %111, %98, %cst_46 {dimension_numbers = #tpu.dot_dimension_numbers<[1], [0], [0], [1], [0, 0, 1, 1], [], []>} : vector<18x18xbf16>, vector<18x32xbf16>, vector<18x32xf32> -> vector<18x32xf32>
    %113 = arith.addf %88, %112 : vector<18x32xf32>
    %cst_47 = arith.constant 0.000000e+00 : f32
    %114 = vector.shape_cast %65 : vector<1x32xi1> to vector<1x32xi1>
    %115 = vector.broadcast %114 : vector<1x32xi1> to vector<18x32xi1>
    %116 = vector.broadcast %cst_47 : f32 to vector<18x32xf32>
    %117 = arith.select %115, %84, %116 : vector<18x32xi1>, vector<18x32xf32>
    %118 = arith.truncf %117 : vector<18x32xf32> to vector<18x32xbf16>
    %cst_48 = arith.constant 0.000000e+00 : f32
    %119 = vector.shape_cast %65 : vector<1x32xi1> to vector<1x32xi1>
    %120 = vector.broadcast %119 : vector<1x32xi1> to vector<18x32xi1>
    %121 = vector.broadcast %cst_48 : f32 to vector<18x32xf32>
    %122 = arith.select %120, %87, %121 : vector<18x32xi1>, vector<18x32xf32>
    %123 = arith.truncf %122 : vector<18x32xf32> to vector<18x32xbf16>
    %cst_49 = arith.constant dense<0.000000e+00> : vector<18x18xf32>
    %124 = tpu.matmul %118, %86, %cst_49 {dimension_numbers = #tpu.dot_dimension_numbers<[1], [1], [0], [0], [0, 0, 1, 0], [], []>} : vector<18x32xbf16>, vector<18x32xbf16>, vector<18x18xf32> -> vector<18x18xf32>
    %125 = arith.addf %124, %8 : vector<18x18xf32>
    %cst_50 = arith.constant dense<0xFF800000> : vector<18xf32>
    %126 = vector.multi_reduction <maximumf>, %125, %cst_50 [1] : vector<18x18xf32> to vector<18xf32>
    %127 = vector.shape_cast %126 : vector<18xf32> to vector<18x1xf32>
    %128 = vector.broadcast %127 : vector<18x1xf32> to vector<18x18xf32>
    %129 = arith.subf %125, %128 : vector<18x18xf32>
    %130 = math.exp %129 : vector<18x18xf32>
    %cst_51 = arith.constant dense<0.000000e+00> : vector<18xf32>
    %131 = vector.multi_reduction <add>, %130, %cst_51 [1] : vector<18x18xf32> to vector<18xf32>
    %132 = vector.shape_cast %131 : vector<18xf32> to vector<18x1xf32>
    %133 = tpu.reciprocal %132 {approx = true} : vector<18x1xf32> -> vector<18x1xf32>
    %134 = vector.broadcast %133 : vector<18x1xf32> to vector<18x18xf32>
    %135 = arith.mulf %130, %134 : vector<18x18xf32>
    %136 = arith.truncf %135 : vector<18x18xf32> to vector<18x18xbf16>
    %cst_52 = arith.constant dense<0.000000e+00> : vector<18x32xf32>
    %137 = tpu.matmul %136, %123, %cst_52 {dimension_numbers = #tpu.dot_dimension_numbers<[1], [0], [0], [1], [0, 0, 1, 1], [], []>} : vector<18x18xbf16>, vector<18x32xbf16>, vector<18x32xf32> -> vector<18x32xf32>
    %138 = arith.addf %113, %137 : vector<18x32xf32>
    %cst_53 = arith.constant 0.000000e+00 : f32
    %139 = vector.shape_cast %70 : vector<1x32xi1> to vector<1x32xi1>
    %140 = vector.broadcast %139 : vector<1x32xi1> to vector<18x32xi1>
    %141 = vector.broadcast %cst_53 : f32 to vector<18x32xf32>
    %142 = arith.select %140, %84, %141 : vector<18x32xi1>, vector<18x32xf32>
    %143 = arith.truncf %142 : vector<18x32xf32> to vector<18x32xbf16>
    %cst_54 = arith.constant 0.000000e+00 : f32
    %144 = vector.shape_cast %70 : vector<1x32xi1> to vector<1x32xi1>
    %145 = vector.broadcast %144 : vector<1x32xi1> to vector<18x32xi1>
    %146 = vector.broadcast %cst_54 : f32 to vector<18x32xf32>
    %147 = arith.select %145, %87, %146 : vector<18x32xi1>, vector<18x32xf32>
    %148 = arith.truncf %147 : vector<18x32xf32> to vector<18x32xbf16>
    %cst_55 = arith.constant dense<0.000000e+00> : vector<18x18xf32>
    %149 = tpu.matmul %143, %86, %cst_55 {dimension_numbers = #tpu.dot_dimension_numbers<[1], [1], [0], [0], [0, 0, 1, 0], [], []>} : vector<18x32xbf16>, vector<18x32xbf16>, vector<18x18xf32> -> vector<18x18xf32>
    %150 = arith.addf %149, %8 : vector<18x18xf32>
    %cst_56 = arith.constant dense<0xFF800000> : vector<18xf32>
    %151 = vector.multi_reduction <maximumf>, %150, %cst_56 [1] : vector<18x18xf32> to vector<18xf32>
    %152 = vector.shape_cast %151 : vector<18xf32> to vector<18x1xf32>
    %153 = vector.broadcast %152 : vector<18x1xf32> to vector<18x18xf32>
    %154 = arith.subf %150, %153 : vector<18x18xf32>
    %155 = math.exp %154 : vector<18x18xf32>
    %cst_57 = arith.constant dense<0.000000e+00> : vector<18xf32>
    %156 = vector.multi_reduction <add>, %155, %cst_57 [1] : vector<18x18xf32> to vector<18xf32>
    %157 = vector.shape_cast %156 : vector<18xf32> to vector<18x1xf32>
    %158 = tpu.reciprocal %157 {approx = true} : vector<18x1xf32> -> vector<18x1xf32>
    %159 = vector.broadcast %158 : vector<18x1xf32> to vector<18x18xf32>
    %160 = arith.mulf %155, %159 : vector<18x18xf32>
    %161 = arith.truncf %160 : vector<18x18xf32> to vector<18x18xbf16>
    %cst_58 = arith.constant dense<0.000000e+00> : vector<18x32xf32>
    %162 = tpu.matmul %161, %148, %cst_58 {dimension_numbers = #tpu.dot_dimension_numbers<[1], [0], [0], [1], [0, 0, 1, 1], [], []>} : vector<18x18xbf16>, vector<18x32xbf16>, vector<18x32xf32> -> vector<18x32xf32>
    %163 = arith.addf %138, %162 : vector<18x32xf32>
    %cst_59 = arith.constant 0.000000e+00 : f32
    %164 = vector.shape_cast %75 : vector<1x32xi1> to vector<1x32xi1>
    %165 = vector.broadcast %164 : vector<1x32xi1> to vector<18x32xi1>
    %166 = vector.broadcast %cst_59 : f32 to vector<18x32xf32>
    %167 = arith.select %165, %84, %166 : vector<18x32xi1>, vector<18x32xf32>
    %168 = arith.truncf %167 : vector<18x32xf32> to vector<18x32xbf16>
    %cst_60 = arith.constant 0.000000e+00 : f32
    %169 = vector.shape_cast %75 : vector<1x32xi1> to vector<1x32xi1>
    %170 = vector.broadcast %169 : vector<1x32xi1> to vector<18x32xi1>
    %171 = vector.broadcast %cst_60 : f32 to vector<18x32xf32>
    %172 = arith.select %170, %87, %171 : vector<18x32xi1>, vector<18x32xf32>
    %173 = arith.truncf %172 : vector<18x32xf32> to vector<18x32xbf16>
    %cst_61 = arith.constant dense<0.000000e+00> : vector<18x18xf32>
    %174 = tpu.matmul %168, %86, %cst_61 {dimension_numbers = #tpu.dot_dimension_numbers<[1], [1], [0], [0], [0, 0, 1, 0], [], []>} : vector<18x32xbf16>, vector<18x32xbf16>, vector<18x18xf32> -> vector<18x18xf32>
    %175 = arith.addf %174, %8 : vector<18x18xf32>
    %cst_62 = arith.constant dense<0xFF800000> : vector<18xf32>
    %176 = vector.multi_reduction <maximumf>, %175, %cst_62 [1] : vector<18x18xf32> to vector<18xf32>
    %177 = vector.shape_cast %176 : vector<18xf32> to vector<18x1xf32>
    %178 = vector.broadcast %177 : vector<18x1xf32> to vector<18x18xf32>
    %179 = arith.subf %175, %178 : vector<18x18xf32>
    %180 = math.exp %179 : vector<18x18xf32>
    %cst_63 = arith.constant dense<0.000000e+00> : vector<18xf32>
    %181 = vector.multi_reduction <add>, %180, %cst_63 [1] : vector<18x18xf32> to vector<18xf32>
    %182 = vector.shape_cast %181 : vector<18xf32> to vector<18x1xf32>
    %183 = tpu.reciprocal %182 {approx = true} : vector<18x1xf32> -> vector<18x1xf32>
    %184 = vector.broadcast %183 : vector<18x1xf32> to vector<18x18xf32>
    %185 = arith.mulf %180, %184 : vector<18x18xf32>
    %186 = arith.truncf %185 : vector<18x18xf32> to vector<18x18xbf16>
    %cst_64 = arith.constant dense<0.000000e+00> : vector<18x32xf32>
    %187 = tpu.matmul %186, %173, %cst_64 {dimension_numbers = #tpu.dot_dimension_numbers<[1], [0], [0], [1], [0, 0, 1, 1], [], []>} : vector<18x18xbf16>, vector<18x32xbf16>, vector<18x32xf32> -> vector<18x32xf32>
    %188 = arith.addf %163, %187 : vector<18x32xf32>
    %189 = arith.truncf %188 : vector<18x32xf32> to vector<18x32xbf16>
    %c0_65 = arith.constant 0 : index
    %c0_66 = arith.constant 0 : index
    %c0_67 = arith.constant 0 : index
    %190 = vector.load %arg11[%c0_65, %c0_66, %c0_67] : memref<1x32x32xbf16, #tpu.memory_space<vmem>>, vector<1x32x32xbf16>
    %191 = vector.shape_cast %190 : vector<1x32x32xbf16> to vector<32x32xbf16>
    %cst_68 = arith.constant dense<0.000000e+00> : vector<18x32xf32>
    %192 = tpu.matmul %189, %191, %cst_68 {dimension_numbers = #tpu.dot_dimension_numbers<[1], [0], [0], [1], [0, 0, 1, 1], [], []>} : vector<18x32xbf16>, vector<32x32xbf16>, vector<18x32xf32> -> vector<18x32xf32>
    %c0_69 = arith.constant 0 : index
    %c0_70 = arith.constant 0 : index
    %c0_71 = arith.constant 0 : index
    %193 = vector.load %arg12[%c0_69, %c0_70, %c0_71] : memref<1x1x32xf32, #tpu.memory_space<vmem>>, vector<1x1x32xf32>
    %194 = vector.shape_cast %193 : vector<1x1x32xf32> to vector<1x32xf32>
    %195 = vector.broadcast %194 : vector<1x32xf32> to vector<18x32xf32>
    %196 = arith.addf %192, %195 : vector<18x32xf32>
    %197 = arith.addf %54, %196 : vector<18x32xf32>
    %c0_72 = arith.constant 0 : index
    %c0_73 = arith.constant 0 : index
    %c0_74 = arith.constant 0 : index
    %198 = vector.load %arg13[%c0_72, %c0_73, %c0_74] : memref<1x1x32xf32, #tpu.memory_space<vmem>>, vector<1x1x32xf32>
    %199 = vector.shape_cast %198 : vector<1x1x32xf32> to vector<1x32xf32>
    %c0_75 = arith.constant 0 : index
    %c0_76 = arith.constant 0 : index
    %c0_77 = arith.constant 0 : index
    %200 = vector.load %arg14[%c0_75, %c0_76, %c0_77] : memref<1x1x32xf32, #tpu.memory_space<vmem>>, vector<1x1x32xf32>
    %201 = vector.shape_cast %200 : vector<1x1x32xf32> to vector<1x32xf32>
    %cst_78 = arith.constant dense<0.000000e+00> : vector<18xf32>
    %202 = vector.multi_reduction <add>, %197, %cst_78 [1] : vector<18x32xf32> to vector<18xf32>
    %203 = vector.shape_cast %202 : vector<18xf32> to vector<18x1xf32>
    %cst_79 = arith.constant 3.200000e+01 : f32
    %204 = vector.broadcast %cst_79 : f32 to vector<18x1xf32>
    %205 = arith.divf %203, %204 : vector<18x1xf32>
    %206 = vector.broadcast %205 : vector<18x1xf32> to vector<18x32xf32>
    %207 = arith.subf %197, %206 : vector<18x32xf32>
    %208 = arith.mulf %207, %207 : vector<18x32xf32>
    %cst_80 = arith.constant dense<0.000000e+00> : vector<18xf32>
    %209 = vector.multi_reduction <add>, %208, %cst_80 [1] : vector<18x32xf32> to vector<18xf32>
    %210 = vector.shape_cast %209 : vector<18xf32> to vector<18x1xf32>
    %cst_81 = arith.constant 3.200000e+01 : f32
    %211 = vector.broadcast %cst_81 : f32 to vector<18x1xf32>
    %212 = arith.divf %210, %211 : vector<18x1xf32>
    %213 = vector.broadcast %205 : vector<18x1xf32> to vector<18x32xf32>
    %214 = arith.subf %197, %213 : vector<18x32xf32>
    %cst_82 = arith.constant 9.99999974E-6 : f32
    %215 = vector.broadcast %cst_82 : f32 to vector<18x1xf32>
    %216 = arith.addf %212, %215 : vector<18x1xf32>
    %217 = math.rsqrt %216 : vector<18x1xf32>
    %218 = vector.broadcast %217 : vector<18x1xf32> to vector<18x32xf32>
    %219 = arith.mulf %214, %218 : vector<18x32xf32>
    %220 = vector.broadcast %199 : vector<1x32xf32> to vector<18x32xf32>
    %221 = arith.mulf %219, %220 : vector<18x32xf32>
    %222 = vector.broadcast %201 : vector<1x32xf32> to vector<18x32xf32>
    %223 = arith.addf %221, %222 : vector<18x32xf32>
    %224 = vector.broadcast %3 : vector<18x1xf32> to vector<18x32xf32>
    %225 = arith.mulf %223, %224 : vector<18x32xf32>
    %226 = arith.truncf %225 : vector<18x32xf32> to vector<18x32xbf16>
    %c0_83 = arith.constant 0 : index
    %c0_84 = arith.constant 0 : index
    %c0_85 = arith.constant 0 : index
    %227 = vector.load %arg15[%c0_83, %c0_84, %c0_85] : memref<1x32x128xbf16, #tpu.memory_space<vmem>>, vector<1x32x128xbf16>
    %228 = vector.shape_cast %227 : vector<1x32x128xbf16> to vector<32x128xbf16>
    %cst_86 = arith.constant dense<0.000000e+00> : vector<18x128xf32>
    %229 = tpu.matmul %226, %228, %cst_86 {dimension_numbers = #tpu.dot_dimension_numbers<[1], [0], [0], [1], [0, 0, 1, 1], [], []>} : vector<18x32xbf16>, vector<32x128xbf16>, vector<18x128xf32> -> vector<18x128xf32>
    %c0_87 = arith.constant 0 : index
    %c0_88 = arith.constant 0 : index
    %c0_89 = arith.constant 0 : index
    %230 = vector.load %arg16[%c0_87, %c0_88, %c0_89] : memref<1x1x128xf32, #tpu.memory_space<vmem>>, vector<1x1x128xf32>
    %231 = vector.shape_cast %230 : vector<1x1x128xf32> to vector<1x128xf32>
    %232 = vector.broadcast %231 : vector<1x128xf32> to vector<18x128xf32>
    %233 = arith.addf %229, %232 : vector<18x128xf32>
    %234 = arith.mulf %233, %233 : vector<18x128xf32>
    %235 = arith.mulf %233, %234 : vector<18x128xf32>
    %cst_90 = arith.constant 4.471500e-02 : f32
    %236 = vector.broadcast %cst_90 : f32 to vector<18x128xf32>
    %237 = arith.mulf %236, %235 : vector<18x128xf32>
    %238 = arith.addf %233, %237 : vector<18x128xf32>
    %cst_91 = arith.constant 0.797884583 : f32
    %239 = vector.broadcast %cst_91 : f32 to vector<18x128xf32>
    %240 = arith.mulf %239, %238 : vector<18x128xf32>
    %241 = math.tanh %240 : vector<18x128xf32>
    %cst_92 = arith.constant 1.000000e+00 : f32
    %242 = vector.broadcast %cst_92 : f32 to vector<18x128xf32>
    %243 = arith.addf %242, %241 : vector<18x128xf32>
    %cst_93 = arith.constant 5.000000e-01 : f32
    %244 = vector.broadcast %cst_93 : f32 to vector<18x128xf32>
    %245 = arith.mulf %244, %243 : vector<18x128xf32>
    %246 = arith.mulf %233, %245 : vector<18x128xf32>
    %247 = arith.truncf %246 : vector<18x128xf32> to vector<18x128xbf16>
    %c0_94 = arith.constant 0 : index
    %c0_95 = arith.constant 0 : index
    %c0_96 = arith.constant 0 : index
    %248 = vector.load %arg17[%c0_94, %c0_95, %c0_96] : memref<1x128x32xbf16, #tpu.memory_space<vmem>>, vector<1x128x32xbf16>
    %249 = vector.shape_cast %248 : vector<1x128x32xbf16> to vector<128x32xbf16>
    %cst_97 = arith.constant dense<0.000000e+00> : vector<18x32xf32>
    %250 = tpu.matmul %247, %249, %cst_97 {dimension_numbers = #tpu.dot_dimension_numbers<[1], [0], [0], [1], [0, 0, 1, 1], [], []>} : vector<18x128xbf16>, vector<128x32xbf16>, vector<18x32xf32> -> vector<18x32xf32>
    %c0_98 = arith.constant 0 : index
    %c0_99 = arith.constant 0 : index
    %c0_100 = arith.constant 0 : index
    %251 = vector.load %arg18[%c0_98, %c0_99, %c0_100] : memref<1x1x32xf32, #tpu.memory_space<vmem>>, vector<1x1x32xf32>
    %252 = vector.shape_cast %251 : vector<1x1x32xf32> to vector<1x32xf32>
    %253 = vector.broadcast %252 : vector<1x32xf32> to vector<18x32xf32>
    %254 = arith.addf %250, %253 : vector<18x32xf32>
    %255 = arith.addf %225, %254 : vector<18x32xf32>
    %c0_101 = arith.constant 0 : index
    %c0_102 = arith.constant 0 : index
    %c0_103 = arith.constant 0 : index
    %256 = vector.load %arg19[%c0_101, %c0_102, %c0_103] : memref<1x1x32xf32, #tpu.memory_space<vmem>>, vector<1x1x32xf32>
    %257 = vector.shape_cast %256 : vector<1x1x32xf32> to vector<1x32xf32>
    %c0_104 = arith.constant 0 : index
    %c0_105 = arith.constant 0 : index
    %c0_106 = arith.constant 0 : index
    %258 = vector.load %arg20[%c0_104, %c0_105, %c0_106] : memref<1x1x32xf32, #tpu.memory_space<vmem>>, vector<1x1x32xf32>
    %259 = vector.shape_cast %258 : vector<1x1x32xf32> to vector<1x32xf32>
    %cst_107 = arith.constant dense<0.000000e+00> : vector<18xf32>
    %260 = vector.multi_reduction <add>, %255, %cst_107 [1] : vector<18x32xf32> to vector<18xf32>
    %261 = vector.shape_cast %260 : vector<18xf32> to vector<18x1xf32>
    %cst_108 = arith.constant 3.200000e+01 : f32
    %262 = vector.broadcast %cst_108 : f32 to vector<18x1xf32>
    %263 = arith.divf %261, %262 : vector<18x1xf32>
    %264 = vector.broadcast %263 : vector<18x1xf32> to vector<18x32xf32>
    %265 = arith.subf %255, %264 : vector<18x32xf32>
    %266 = arith.mulf %265, %265 : vector<18x32xf32>
    %cst_109 = arith.constant dense<0.000000e+00> : vector<18xf32>
    %267 = vector.multi_reduction <add>, %266, %cst_109 [1] : vector<18x32xf32> to vector<18xf32>
    %268 = vector.shape_cast %267 : vector<18xf32> to vector<18x1xf32>
    %cst_110 = arith.constant 3.200000e+01 : f32
    %269 = vector.broadcast %cst_110 : f32 to vector<18x1xf32>
    %270 = arith.divf %268, %269 : vector<18x1xf32>
    %271 = vector.broadcast %263 : vector<18x1xf32> to vector<18x32xf32>
    %272 = arith.subf %255, %271 : vector<18x32xf32>
    %cst_111 = arith.constant 9.99999974E-6 : f32
    %273 = vector.broadcast %cst_111 : f32 to vector<18x1xf32>
    %274 = arith.addf %270, %273 : vector<18x1xf32>
    %275 = math.rsqrt %274 : vector<18x1xf32>
    %276 = vector.broadcast %275 : vector<18x1xf32> to vector<18x32xf32>
    %277 = arith.mulf %272, %276 : vector<18x32xf32>
    %278 = vector.broadcast %257 : vector<1x32xf32> to vector<18x32xf32>
    %279 = arith.mulf %277, %278 : vector<18x32xf32>
    %280 = vector.broadcast %259 : vector<1x32xf32> to vector<18x32xf32>
    %281 = arith.addf %279, %280 : vector<18x32xf32>
    %282 = vector.broadcast %3 : vector<18x1xf32> to vector<18x32xf32>
    %283 = arith.mulf %281, %282 : vector<18x32xf32>
    %284 = arith.truncf %283 : vector<18x32xf32> to vector<18x32xbf16>
    %c0_112 = arith.constant 0 : index
    %c0_113 = arith.constant 0 : index
    %285 = vector.load %arg25[%c0_112, %c0_113] : memref<32x64xbf16, #tpu.memory_space<vmem>>, vector<32x64xbf16>
    %cst_114 = arith.constant dense<0.000000e+00> : vector<18x64xf32>
    %286 = tpu.matmul %284, %285, %cst_114 {dimension_numbers = #tpu.dot_dimension_numbers<[1], [0], [0], [1], [0, 0, 1, 1], [], []>} : vector<18x32xbf16>, vector<32x64xbf16>, vector<18x64xf32> -> vector<18x64xf32>
    %c0_115 = arith.constant 0 : index
    %c0_116 = arith.constant 0 : index
    %287 = vector.load %arg26[%c0_115, %c0_116] : memref<1x64xf32, #tpu.memory_space<vmem>>, vector<1x64xf32>
    %288 = vector.broadcast %287 : vector<1x64xf32> to vector<18x64xf32>
    %289 = arith.addf %286, %288 : vector<18x64xf32>
    %290 = vector.broadcast %3 : vector<18x1xf32> to vector<18x64xf32>
    %291 = arith.mulf %289, %290 : vector<18x64xf32>
    %c0_117 = arith.constant 0 : index
    %c0_118 = arith.constant 0 : index
    %c0_119 = arith.constant 0 : index
    %292 = vector.load %arg29[%c0_117, %c0_118, %c0_119] : memref<1x18x64xf32, #tpu.memory_space<vmem>>, vector<1x18x64xf32>
    %293 = vector.shape_cast %292 : vector<1x18x64xf32> to vector<18x64xf32>
    %294 = vector.shape_cast %291 : vector<18x64xf32> to vector<1x18x64xf32>
    tpu.vector_store %arg29[%c0_117, %c0_118, %c0_119], %294 {strides = array<i32>} : memref<1x18x64xf32, #tpu.memory_space<vmem>>, vector<1x18x64xf32>,
    %295 = vector.extract_strided_slice %283 {offsets = [0, 0], sizes = [2, 32], strides = [1, 1]} : vector<18x32xf32> to vector<2x32xf32>
    %296 = arith.truncf %295 : vector<2x32xf32> to vector<2x32xbf16>
    %c0_120 = arith.constant 0 : index
    %c0_121 = arith.constant 0 : index
    %c0_122 = arith.constant 0 : index
    %297 = vector.load %arg21[%c0_120, %c0_121, %c0_122] : memref<2x32x32xbf16, #tpu.memory_space<vmem>>, vector<1x32x32xbf16>
    %298 = vector.shape_cast %297 : vector<1x32x32xbf16> to vector<32x32xbf16>
    %cst_123 = arith.constant dense<0.000000e+00> : vector<2x32xf32>
    %299 = tpu.matmul %296, %298, %cst_123 {dimension_numbers = #tpu.dot_dimension_numbers<[1], [0], [0], [1], [0, 0, 1, 1], [], []>} : vector<2x32xbf16>, vector<32x32xbf16>, vector<2x32xf32> -> vector<2x32xf32>
    %c0_124 = arith.constant 0 : index
    %c0_125 = arith.constant 0 : index
    %c0_126 = arith.constant 0 : index
    %300 = vector.load %arg22[%c0_124, %c0_125, %c0_126] : memref<2x1x32xf32, #tpu.memory_space<vmem>>, vector<1x1x32xf32>
    %301 = vector.shape_cast %300 : vector<1x1x32xf32> to vector<1x32xf32>
    %302 = vector.broadcast %301 : vector<1x32xf32> to vector<2x32xf32>
    %303 = arith.addf %299, %302 : vector<2x32xf32>
    %304 = arith.mulf %303, %303 : vector<2x32xf32>
    %305 = arith.mulf %303, %304 : vector<2x32xf32>
    %cst_127 = arith.constant 4.471500e-02 : f32
    %306 = vector.broadcast %cst_127 : f32 to vector<2x32xf32>
    %307 = arith.mulf %306, %305 : vector<2x32xf32>
    %308 = arith.addf %303, %307 : vector<2x32xf32>
    %cst_128 = arith.constant 0.797884583 : f32
    %309 = vector.broadcast %cst_128 : f32 to vector<2x32xf32>
    %310 = arith.mulf %309, %308 : vector<2x32xf32>
    %311 = math.tanh %310 : vector<2x32xf32>
    %cst_129 = arith.constant 1.000000e+00 : f32
    %312 = vector.broadcast %cst_129 : f32 to vector<2x32xf32>
    %313 = arith.addf %312, %311 : vector<2x32xf32>
    %cst_130 = arith.constant 5.000000e-01 : f32
    %314 = vector.broadcast %cst_130 : f32 to vector<2x32xf32>
    %315 = arith.mulf %314, %313 : vector<2x32xf32>
    %316 = arith.mulf %303, %315 : vector<2x32xf32>
    %317 = arith.truncf %316 : vector<2x32xf32> to vector<2x32xbf16>
    %c1_131 = arith.constant 1 : index
    %c0_132 = arith.constant 0 : index
    %c0_133 = arith.constant 0 : index
    %318 = vector.load %arg21[%c1_131, %c0_132, %c0_133] : memref<2x32x32xbf16, #tpu.memory_space<vmem>>, vector<1x32x32xbf16>
    %319 = vector.shape_cast %318 : vector<1x32x32xbf16> to vector<32x32xbf16>
    %cst_134 = arith.constant dense<0.000000e+00> : vector<2x32xf32>
    %320 = tpu.matmul %317, %319, %cst_134 {dimension_numbers = #tpu.dot_dimension_numbers<[1], [0], [0], [1], [0, 0, 1, 1], [], []>} : vector<2x32xbf16>, vector<32x32xbf16>, vector<2x32xf32> -> vector<2x32xf32>
    %c1_135 = arith.constant 1 : index
    %c0_136 = arith.constant 0 : index
    %c0_137 = arith.constant 0 : index
    %321 = vector.load %arg22[%c1_135, %c0_136, %c0_137] : memref<2x1x32xf32, #tpu.memory_space<vmem>>, vector<1x1x32xf32>
    %322 = vector.shape_cast %321 : vector<1x1x32xf32> to vector<1x32xf32>
    %323 = vector.broadcast %322 : vector<1x32xf32> to vector<2x32xf32>
    %324 = arith.addf %320, %323 : vector<2x32xf32>
    %325 = arith.mulf %324, %324 : vector<2x32xf32>
    %326 = arith.mulf %324, %325 : vector<2x32xf32>
    %cst_138 = arith.constant 4.471500e-02 : f32
    %327 = vector.broadcast %cst_138 : f32 to vector<2x32xf32>
    %328 = arith.mulf %327, %326 : vector<2x32xf32>
    %329 = arith.addf %324, %328 : vector<2x32xf32>
    %cst_139 = arith.constant 0.797884583 : f32
    %330 = vector.broadcast %cst_139 : f32 to vector<2x32xf32>
    %331 = arith.mulf %330, %329 : vector<2x32xf32>
    %332 = math.tanh %331 : vector<2x32xf32>
    %cst_140 = arith.constant 1.000000e+00 : f32
    %333 = vector.broadcast %cst_140 : f32 to vector<2x32xf32>
    %334 = arith.addf %333, %332 : vector<2x32xf32>
    %cst_141 = arith.constant 5.000000e-01 : f32
    %335 = vector.broadcast %cst_141 : f32 to vector<2x32xf32>
    %336 = arith.mulf %335, %334 : vector<2x32xf32>
    %337 = arith.mulf %324, %336 : vector<2x32xf32>
    %c0_142 = arith.constant 0 : index
    %c0_143 = arith.constant 0 : index
    %338 = vector.load %arg23[%c0_142, %c0_143] : memref<1x32xf32, #tpu.memory_space<vmem>>, vector<1x32xf32>
    %339 = vector.broadcast %338 : vector<1x32xf32> to vector<2x32xf32>
    %340 = arith.mulf %337, %339 : vector<2x32xf32>
    %cst_144 = arith.constant dense<0.000000e+00> : vector<2xf32>
    %341 = vector.multi_reduction <add>, %340, %cst_144 [1] : vector<2x32xf32> to vector<2xf32>
    %342 = vector.shape_cast %341 : vector<2xf32> to vector<2x1xf32>
    %c0_145 = arith.constant 0 : index
    %c0_146 = arith.constant 0 : index
    %343 = vector.load %arg24[%c0_145, %c0_146] : memref<1x1xf32, #tpu.memory_space<vmem>>, vector<1x1xf32>
    %344 = vector.broadcast %343 : vector<1x1xf32> to vector<2x1xf32>
    %345 = arith.addf %342, %344 : vector<2x1xf32>
    %cst_147 = arith.constant 0.000000e+00 : f32
    %346 = vector.broadcast %cst_147 : f32 to vector<2x95xf32>
    %347 = tpu.concatenate %295, %345, %346 in 1 : vector<2x32xf32>, vector<2x1xf32>, vector<2x95xf32> -> vector<2x128xf32>
    %c0_148 = arith.constant 0 : index
    %c0_149 = arith.constant 0 : index
    %c0_150 = arith.constant 0 : index
    %348 = vector.load %arg28[%c0_148, %c0_149, %c0_150] : memref<1x2x128xf32, #tpu.memory_space<vmem>>, vector<1x2x128xf32>
    %349 = vector.shape_cast %348 : vector<1x2x128xf32> to vector<2x128xf32>
    %350 = vector.shape_cast %347 : vector<2x128xf32> to vector<1x2x128xf32>
    tpu.vector_store %arg28[%c0_148, %c0_149, %c0_150], %350 {strides = array<i32>} : memref<1x2x128xf32, #tpu.memory_space<vmem>>, vector<1x2x128xf32>,
    %c0_151 = arith.constant 0 : index
    %c0_152 = arith.constant 0 : index
    %351 = vector.load %arg6[%c0_151, %c0_152] : memref<8x8xf32, #tpu.memory_space<vmem>>, vector<8x8xf32>
    %c0_153 = arith.constant 0 : index
    %c0_154 = arith.constant 0 : index
    %c0_155 = arith.constant 0 : index
    %352 = vector.load %arg5[%c0_153, %c0_154, %c0_155] : memref<1x2x8xf32, #tpu.memory_space<vmem>>, vector<1x2x8xf32>
    %353 = vector.shape_cast %352 : vector<1x2x8xf32> to vector<2x8xf32>
    %354 = vector.extract_strided_slice %291 {offsets = [2, 0], sizes = [8, 64], strides = [1, 1]} : vector<18x64xf32> to vector<8x64xf32>
    %355 = vector.extract_strided_slice %3 {offsets = [2, 0], sizes = [8, 1], strides = [1, 1]} : vector<18x1xf32> to vector<8x1xf32>
    %356 = vector.extract_strided_slice %354 {offsets = [0, 0], sizes = [8, 32], strides = [1, 1]} : vector<8x64xf32> to vector<8x32xf32>
    %357 = arith.truncf %356 : vector<8x32xf32> to vector<8x32xbf16>
    %358 = vector.extract_strided_slice %354 {offsets = [0, 32], sizes = [8, 32], strides = [1, 1]} : vector<8x64xf32> to vector<8x32xf32>
    %359 = arith.truncf %358 : vector<8x32xf32> to vector<8x32xbf16>
    %cst_156 = arith.constant dense<0.000000e+00> : vector<8x8xf32>
    %360 = tpu.matmul %357, %359, %cst_156 {dimension_numbers = #tpu.dot_dimension_numbers<[1], [1], [0], [0], [0, 0, 1, 0], [], []>} : vector<8x32xbf16>, vector<8x32xbf16>, vector<8x8xf32> -> vector<8x8xf32>
    %cst_157 = arith.constant 3.125000e-02 : f32
    %361 = vector.broadcast %cst_157 : f32 to vector<8x8xf32>
    %362 = arith.mulf %360, %361 : vector<8x8xf32>
    %363 = tpu.transpose %362, [1, 0] : vector<8x8xf32> -> vector<8x8xf32>
    %364 = arith.addf %362, %363 : vector<8x8xf32>
    %cst_158 = arith.constant 5.000000e-01 : f32
    %365 = vector.broadcast %cst_158 : f32 to vector<8x8xf32>
    %366 = arith.mulf %365, %364 : vector<8x8xf32>
    %367 = vector.extract_strided_slice %353 {offsets = [0, 0], sizes = [1, 8], strides = [1, 1]} : vector<2x8xf32> to vector<1x8xf32>
    %368 = vector.broadcast %355 : vector<8x1xf32> to vector<8x8xf32>
    %369 = vector.broadcast %367 : vector<1x8xf32> to vector<8x8xf32>
    %370 = arith.mulf %368, %369 : vector<8x8xf32>
    %371 = arith.mulf %370, %351 : vector<8x8xf32>
    %cst_159 = arith.constant 5.000000e-01 : f32
    %372 = vector.broadcast %cst_159 : f32 to vector<8x8xf32>
    %373 = arith.cmpf ogt, %371, %372 : vector<8x8xf32>
    %cst_160 = arith.constant 0.000000e+00 : f32
    %cst_161 = arith.constant -103.278931 : f32
    %374 = vector.broadcast %cst_160 : f32 to vector<8x8xf32>
    %375 = vector.broadcast %cst_161 : f32 to vector<8x8xf32>
    %376 = arith.select %373, %374, %375 : vector<8x8xi1>, vector<8x8xf32>
    %377 = arith.addf %366, %376 : vector<8x8xf32>
    %378 = vector.extract_strided_slice %377 {offsets = [0, 0], sizes = [1, 8], strides = [1, 1]} : vector<8x8xf32> to vector<1x8xf32>
    %379 = vector.extract_strided_slice %377 {offsets = [1, 0], sizes = [1, 8], strides = [1, 1]} : vector<8x8xf32> to vector<1x8xf32>
    %380 = vector.extract_strided_slice %377 {offsets = [2, 0], sizes = [1, 8], strides = [1, 1]} : vector<8x8xf32> to vector<1x8xf32>
    %381 = vector.extract_strided_slice %377 {offsets = [3, 0], sizes = [1, 8], strides = [1, 1]} : vector<8x8xf32> to vector<1x8xf32>
    %382 = vector.extract_strided_slice %377 {offsets = [4, 0], sizes = [1, 8], strides = [1, 1]} : vector<8x8xf32> to vector<1x8xf32>
    %383 = vector.extract_strided_slice %377 {offsets = [5, 0], sizes = [1, 8], strides = [1, 1]} : vector<8x8xf32> to vector<1x8xf32>
    %384 = vector.extract_strided_slice %377 {offsets = [6, 0], sizes = [1, 8], strides = [1, 1]} : vector<8x8xf32> to vector<1x8xf32>
    %385 = vector.extract_strided_slice %377 {offsets = [7, 0], sizes = [1, 8], strides = [1, 1]} : vector<8x8xf32> to vector<1x8xf32>
    %386 = tpu.concatenate %378, %379, %380, %381, %382, %383, %384, %385 in 1 : vector<1x8xf32>, vector<1x8xf32>, vector<1x8xf32>, vector<1x8xf32>, vector<1x8xf32>, vector<1x8xf32>, vector<1x8xf32>, vector<1x8xf32> -> vector<1x64xf32>
    %cst_162 = arith.constant dense<0xFF800000> : vector<1xf32>
    %387 = vector.multi_reduction <maximumf>, %386, %cst_162 [1] : vector<1x64xf32> to vector<1xf32>
    %388 = vector.shape_cast %387 : vector<1xf32> to vector<1x1xf32>
    %389 = vector.broadcast %388 : vector<1x1xf32> to vector<1x64xf32>
    %390 = arith.subf %386, %389 : vector<1x64xf32>
    %391 = math.exp %390 : vector<1x64xf32>
    %cst_163 = arith.constant dense<0.000000e+00> : vector<1xf32>
    %392 = vector.multi_reduction <add>, %391, %cst_163 [1] : vector<1x64xf32> to vector<1xf32>
    %393 = vector.shape_cast %392 : vector<1xf32> to vector<1x1xf32>
    %394 = math.log %393 : vector<1x1xf32>
    %395 = arith.addf %388, %394 : vector<1x1xf32>
    %396 = vector.broadcast %395 : vector<1x1xf32> to vector<1x64xf32>
    %397 = arith.subf %386, %396 : vector<1x64xf32>
    %cst_164 = arith.constant 0.000000e+00 : f32
    %398 = vector.broadcast %cst_164 : f32 to vector<1x64xf32>
    %399 = tpu.concatenate %397, %398 in 1 : vector<1x64xf32>, vector<1x64xf32> -> vector<1x128xf32>
    %400 = vector.extract_strided_slice %291 {offsets = [10, 0], sizes = [8, 64], strides = [1, 1]} : vector<18x64xf32> to vector<8x64xf32>
    %401 = vector.extract_strided_slice %3 {offsets = [10, 0], sizes = [8, 1], strides = [1, 1]} : vector<18x1xf32> to vector<8x1xf32>
    %402 = vector.extract_strided_slice %400 {offsets = [0, 0], sizes = [8, 32], strides = [1, 1]} : vector<8x64xf32> to vector<8x32xf32>
    %403 = arith.truncf %402 : vector<8x32xf32> to vector<8x32xbf16>
    %404 = vector.extract_strided_slice %400 {offsets = [0, 32], sizes = [8, 32], strides = [1, 1]} : vector<8x64xf32> to vector<8x32xf32>
    %405 = arith.truncf %404 : vector<8x32xf32> to vector<8x32xbf16>
    %cst_165 = arith.constant dense<0.000000e+00> : vector<8x8xf32>
    %406 = tpu.matmul %403, %405, %cst_165 {dimension_numbers = #tpu.dot_dimension_numbers<[1], [1], [0], [0], [0, 0, 1, 0], [], []>} : vector<8x32xbf16>, vector<8x32xbf16>, vector<8x8xf32> -> vector<8x8xf32>
    %cst_166 = arith.constant 3.125000e-02 : f32
    %407 = vector.broadcast %cst_166 : f32 to vector<8x8xf32>
    %408 = arith.mulf %406, %407 : vector<8x8xf32>
    %409 = tpu.transpose %408, [1, 0] : vector<8x8xf32> -> vector<8x8xf32>
    %410 = arith.addf %408, %409 : vector<8x8xf32>
    %cst_167 = arith.constant 5.000000e-01 : f32
    %411 = vector.broadcast %cst_167 : f32 to vector<8x8xf32>
    %412 = arith.mulf %411, %410 : vector<8x8xf32>
    %413 = vector.extract_strided_slice %353 {offsets = [1, 0], sizes = [1, 8], strides = [1, 1]} : vector<2x8xf32> to vector<1x8xf32>
    %414 = vector.broadcast %401 : vector<8x1xf32> to vector<8x8xf32>
    %415 = vector.broadcast %413 : vector<1x8xf32> to vector<8x8xf32>
    %416 = arith.mulf %414, %415 : vector<8x8xf32>
    %417 = arith.mulf %416, %351 : vector<8x8xf32>
    %cst_168 = arith.constant 5.000000e-01 : f32
    %418 = vector.broadcast %cst_168 : f32 to vector<8x8xf32>
    %419 = arith.cmpf ogt, %417, %418 : vector<8x8xf32>
    %cst_169 = arith.constant 0.000000e+00 : f32
    %cst_170 = arith.constant -103.278931 : f32
    %420 = vector.broadcast %cst_169 : f32 to vector<8x8xf32>
    %421 = vector.broadcast %cst_170 : f32 to vector<8x8xf32>
    %422 = arith.select %419, %420, %421 : vector<8x8xi1>, vector<8x8xf32>
    %423 = arith.addf %412, %422 : vector<8x8xf32>
    %424 = vector.extract_strided_slice %423 {offsets = [0, 0], sizes = [1, 8], strides = [1, 1]} : vector<8x8xf32> to vector<1x8xf32>
    %425 = vector.extract_strided_slice %423 {offsets = [1, 0], sizes = [1, 8], strides = [1, 1]} : vector<8x8xf32> to vector<1x8xf32>
    %426 = vector.extract_strided_slice %423 {offsets = [2, 0], sizes = [1, 8], strides = [1, 1]} : vector<8x8xf32> to vector<1x8xf32>
    %427 = vector.extract_strided_slice %423 {offsets = [3, 0], sizes = [1, 8], strides = [1, 1]} : vector<8x8xf32> to vector<1x8xf32>
    %428 = vector.extract_strided_slice %423 {offsets = [4, 0], sizes = [1, 8], strides = [1, 1]} : vector<8x8xf32> to vector<1x8xf32>
    %429 = vector.extract_strided_slice %423 {offsets = [5, 0], sizes = [1, 8], strides = [1, 1]} : vector<8x8xf32> to vector<1x8xf32>
    %430 = vector.extract_strided_slice %423 {offsets = [6, 0], sizes = [1, 8], strides = [1, 1]} : vector<8x8xf32> to vector<1x8xf32>
    %431 = vector.extract_strided_slice %423 {offsets = [7, 0], sizes = [1, 8], strides = [1, 1]} : vector<8x8xf32> to vector<1x8xf32>
    %432 = tpu.concatenate %424, %425, %426, %427, %428, %429, %430, %431 in 1 : vector<1x8xf32>, vector<1x8xf32>, vector<1x8xf32>, vector<1x8xf32>, vector<1x8xf32>, vector<1x8xf32>, vector<1x8xf32>, vector<1x8xf32> -> vector<1x64xf32>
    %cst_171 = arith.constant dense<0xFF800000> : vector<1xf32>
    %433 = vector.multi_reduction <maximumf>, %432, %cst_171 [1] : vector<1x64xf32> to vector<1xf32>
    %434 = vector.shape_cast %433 : vector<1xf32> to vector<1x1xf32>
    %435 = vector.broadcast %434 : vector<1x1xf32> to vector<1x64xf32>
    %436 = arith.subf %432, %435 : vector<1x64xf32>
    %437 = math.exp %436 : vector<1x64xf32>
    %cst_172 = arith.constant dense<0.000000e+00> : vector<1xf32>
    %438 = vector.multi_reduction <add>, %437, %cst_172 [1] : vector<1x64xf32> to vector<1xf32>
    %439 = vector.shape_cast %438 : vector<1xf32> to vector<1x1xf32>
    %440 = math.log %439 : vector<1x1xf32>
    %441 = arith.addf %434, %440 : vector<1x1xf32>
    %442 = vector.broadcast %441 : vector<1x1xf32> to vector<1x64xf32>
    %443 = arith.subf %432, %442 : vector<1x64xf32>
    %cst_173 = arith.constant 0.000000e+00 : f32
    %444 = vector.broadcast %cst_173 : f32 to vector<1x64xf32>
    %445 = tpu.concatenate %443, %444 in 1 : vector<1x64xf32>, vector<1x64xf32> -> vector<1x128xf32>
    %446 = tpu.concatenate %399, %445 in 0 : vector<1x128xf32>, vector<1x128xf32> -> vector<2x128xf32>
    %c0_174 = arith.constant 0 : index
    %c0_175 = arith.constant 0 : index
    %c0_176 = arith.constant 0 : index
    %447 = vector.load %arg27[%c0_174, %c0_175, %c0_176] : memref<1x2x128xf32, #tpu.memory_space<vmem>>, vector<1x2x128xf32>
    %448 = vector.shape_cast %447 : vector<1x2x128xf32> to vector<2x128xf32>
    %449 = vector.shape_cast %446 : vector<2x128xf32> to vector<1x2x128xf32>
    tpu.vector_store %arg27[%c0_174, %c0_175, %c0_176], %449 {strides = array<i32>} : memref<1x2x128xf32, #tpu.memory_space<vmem>>, vector<1x2x128xf32>,
    return
  }
  func.func @transform_0(%arg0: i32) -> (i32, i32, i32) {
    %c0_i32 = arith.constant 0 : i32
    %c0_i32_0 = arith.constant 0 : i32
    %c0_i32_1 = arith.constant 0 : i32
    return %arg0, %c0_i32, %c0_i32_0 : i32, i32, i32
  }
  func.func @transform_1(%arg0: i32) -> (i32, i32, i32) {
    %c0_i32 = arith.constant 0 : i32
    %c0_i32_0 = arith.constant 0 : i32
    %c0_i32_1 = arith.constant 0 : i32
    return %arg0, %c0_i32, %c0_i32_0 : i32, i32, i32
  }
  func.func @transform_2(%arg0: i32) -> (i32, i32, i32) {
    %c0_i32 = arith.constant 0 : i32
    %c0_i32_0 = arith.constant 0 : i32
    %c0_i32_1 = arith.constant 0 : i32
    return %arg0, %c0_i32, %c0_i32_0 : i32, i32, i32
  }
  func.func @transform_3(%arg0: i32) -> (i32, i32) {
    %c0_i32 = arith.constant 0 : i32
    %c0_i32_0 = arith.constant 0 : i32
    %c0_i32_1 = arith.constant 0 : i32
    return %c0_i32, %c0_i32_0 : i32, i32
  }
  func.func @transform_4(%arg0: i32) -> (i32, i32, i32) {
    %c0_i32 = arith.constant 0 : i32
    %c0_i32_0 = arith.constant 0 : i32
    %c0_i32_1 = arith.constant 0 : i32
    return %arg0, %c0_i32, %c0_i32_0 : i32, i32, i32
  }
  func.func @transform_5(%arg0: i32) -> (i32, i32) {
    %c0_i32 = arith.constant 0 : i32
    %c0_i32_0 = arith.constant 0 : i32
    %c0_i32_1 = arith.constant 0 : i32
    return %c0_i32, %c0_i32_0 : i32, i32
  }
  func.func @transform_6(%arg0: i32) -> (i32, i32, i32) {
    %c0_i32 = arith.constant 0 : i32
    %c0_i32_0 = arith.constant 0 : i32
    %c0_i32_1 = arith.constant 0 : i32
    %c0_i32_2 = arith.constant 0 : i32
    return %c0_i32, %c0_i32_0, %c0_i32_1 : i32, i32, i32
  }
  func.func @transform_7(%arg0: i32) -> (i32, i32, i32) {
    %c0_i32 = arith.constant 0 : i32
    %c0_i32_0 = arith.constant 0 : i32
    %c0_i32_1 = arith.constant 0 : i32
    %c0_i32_2 = arith.constant 0 : i32
    return %c0_i32, %c0_i32_0, %c0_i32_1 : i32, i32, i32
  }
  func.func @transform_8(%arg0: i32) -> (i32, i32, i32) {
    %c0_i32 = arith.constant 0 : i32
    %c0_i32_0 = arith.constant 0 : i32
    %c0_i32_1 = arith.constant 0 : i32
    %c0_i32_2 = arith.constant 0 : i32
    return %c0_i32, %c0_i32_0, %c0_i32_1 : i32, i32, i32
  }
  func.func @transform_9(%arg0: i32) -> (i32, i32, i32) {
    %c0_i32 = arith.constant 0 : i32
    %c0_i32_0 = arith.constant 0 : i32
    %c0_i32_1 = arith.constant 0 : i32
    %c0_i32_2 = arith.constant 0 : i32
    return %c0_i32, %c0_i32_0, %c0_i32_1 : i32, i32, i32
  }
  func.func @transform_10(%arg0: i32) -> (i32, i32, i32) {
    %c0_i32 = arith.constant 0 : i32
    %c0_i32_0 = arith.constant 0 : i32
    %c0_i32_1 = arith.constant 0 : i32
    %c0_i32_2 = arith.constant 0 : i32
    return %c0_i32, %c0_i32_0, %c0_i32_1 : i32, i32, i32
  }
  func.func @transform_11(%arg0: i32) -> (i32, i32, i32) {
    %c0_i32 = arith.constant 0 : i32
    %c0_i32_0 = arith.constant 0 : i32
    %c0_i32_1 = arith.constant 0 : i32
    %c0_i32_2 = arith.constant 0 : i32
    return %c0_i32, %c0_i32_0, %c0_i32_1 : i32, i32, i32
  }
  func.func @transform_12(%arg0: i32) -> (i32, i32, i32) {
    %c0_i32 = arith.constant 0 : i32
    %c0_i32_0 = arith.constant 0 : i32
    %c0_i32_1 = arith.constant 0 : i32
    %c0_i32_2 = arith.constant 0 : i32
    return %c0_i32, %c0_i32_0, %c0_i32_1 : i32, i32, i32
  }
  func.func @transform_13(%arg0: i32) -> (i32, i32, i32) {
    %c0_i32 = arith.constant 0 : i32
    %c0_i32_0 = arith.constant 0 : i32
    %c0_i32_1 = arith.constant 0 : i32
    %c0_i32_2 = arith.constant 0 : i32
    return %c0_i32, %c0_i32_0, %c0_i32_1 : i32, i32, i32
  }
  func.func @transform_14(%arg0: i32) -> (i32, i32, i32) {
    %c0_i32 = arith.constant 0 : i32
    %c0_i32_0 = arith.constant 0 : i32
    %c0_i32_1 = arith.constant 0 : i32
    %c0_i32_2 = arith.constant 0 : i32
    return %c0_i32, %c0_i32_0, %c0_i32_1 : i32, i32, i32
  }
  func.func @transform_15(%arg0: i32) -> (i32, i32, i32) {
    %c0_i32 = arith.constant 0 : i32
    %c0_i32_0 = arith.constant 0 : i32
    %c0_i32_1 = arith.constant 0 : i32
    %c0_i32_2 = arith.constant 0 : i32
    return %c0_i32, %c0_i32_0, %c0_i32_1 : i32, i32, i32
  }
  func.func @transform_16(%arg0: i32) -> (i32, i32, i32) {
    %c0_i32 = arith.constant 0 : i32
    %c0_i32_0 = arith.constant 0 : i32
    %c0_i32_1 = arith.constant 0 : i32
    %c0_i32_2 = arith.constant 0 : i32
    return %c0_i32, %c0_i32_0, %c0_i32_1 : i32, i32, i32
  }
  func.func @transform_17(%arg0: i32) -> (i32, i32, i32) {
    %c0_i32 = arith.constant 0 : i32
    %c0_i32_0 = arith.constant 0 : i32
    %c0_i32_1 = arith.constant 0 : i32
    %c0_i32_2 = arith.constant 0 : i32
    return %c0_i32, %c0_i32_0, %c0_i32_1 : i32, i32, i32
  }
  func.func @transform_18(%arg0: i32) -> (i32, i32, i32) {
    %c0_i32 = arith.constant 0 : i32
    %c0_i32_0 = arith.constant 0 : i32
    %c0_i32_1 = arith.constant 0 : i32
    %c0_i32_2 = arith.constant 0 : i32
    return %c0_i32, %c0_i32_0, %c0_i32_1 : i32, i32, i32
  }
  func.func @transform_19(%arg0: i32) -> (i32, i32, i32) {
    %c0_i32 = arith.constant 0 : i32
    %c0_i32_0 = arith.constant 0 : i32
    %c0_i32_1 = arith.constant 0 : i32
    %c0_i32_2 = arith.constant 0 : i32
    return %c0_i32, %c0_i32_0, %c0_i32_1 : i32, i32, i32
  }
  func.func @transform_20(%arg0: i32) -> (i32, i32, i32) {
    %c0_i32 = arith.constant 0 : i32
    %c0_i32_0 = arith.constant 0 : i32
    %c0_i32_1 = arith.constant 0 : i32
    %c0_i32_2 = arith.constant 0 : i32
    return %c0_i32, %c0_i32_0, %c0_i32_1 : i32, i32, i32
  }
  func.func @transform_21(%arg0: i32) -> (i32, i32, i32) {
    %c0_i32 = arith.constant 0 : i32
    %c0_i32_0 = arith.constant 0 : i32
    %c0_i32_1 = arith.constant 0 : i32
    %c0_i32_2 = arith.constant 0 : i32
    return %c0_i32, %c0_i32_0, %c0_i32_1 : i32, i32, i32
  }
  func.func @transform_22(%arg0: i32) -> (i32, i32) {
    %c0_i32 = arith.constant 0 : i32
    %c0_i32_0 = arith.constant 0 : i32
    %c0_i32_1 = arith.constant 0 : i32
    return %c0_i32, %c0_i32_0 : i32, i32
  }
  func.func @transform_23(%arg0: i32) -> (i32, i32) {
    %c0_i32 = arith.constant 0 : i32
    %c0_i32_0 = arith.constant 0 : i32
    %c0_i32_1 = arith.constant 0 : i32
    return %c0_i32, %c0_i32_0 : i32, i32
  }
  func.func @transform_24(%arg0: i32) -> (i32, i32) {
    %c0_i32 = arith.constant 0 : i32
    %c0_i32_0 = arith.constant 0 : i32
    %c0_i32_1 = arith.constant 0 : i32
    return %c0_i32, %c0_i32_0 : i32, i32
  }
  func.func @transform_25(%arg0: i32) -> (i32, i32) {
    %c0_i32 = arith.constant 0 : i32
    %c0_i32_0 = arith.constant 0 : i32
    %c0_i32_1 = arith.constant 0 : i32
    return %c0_i32, %c0_i32_0 : i32, i32
  }
  func.func @transform_26(%arg0: i32) -> (i32, i32, i32) {
    %c0_i32 = arith.constant 0 : i32
    %c0_i32_0 = arith.constant 0 : i32
    %c0_i32_1 = arith.constant 0 : i32
    return %arg0, %c0_i32, %c0_i32_0 : i32, i32, i32
  }
  func.func @transform_27(%arg0: i32) -> (i32, i32, i32) {
    %c0_i32 = arith.constant 0 : i32
    %c0_i32_0 = arith.constant 0 : i32
    %c0_i32_1 = arith.constant 0 : i32
    return %arg0, %c0_i32, %c0_i32_0 : i32, i32, i32
  }
  func.func @transform_28(%arg0: i32) -> (i32, i32, i32) {
    %c0_i32 = arith.constant 0 : i32
    %c0_i32_0 = arith.constant 0 : i32
    %c0_i32_1 = arith.constant 0 : i32
    return %arg0, %c0_i32, %c0_i32_0 : i32, i32, i32
  }
}

</mosaic_0001>

<bundles_post_ra>
// kernel: tpu_custom_call.1
= control target key start
LH: loop header
LB: loop body
LE: loop exit
PB: predicated region body
PF: predicated region fallthrough
CT: control target
= control target key end

     0   :  { %s3566_s0 = inlined_call_operand.vmem [shape: f32[1,18,32], index: 0, kind: input, shape index: {}]   ;;  %s3567_s1 = inlined_call_operand.vmem [shape: f32[1,18,1], index: 1, kind: input, shape index: {}]   ;;  %s3568_s2 = inlined_call_operand.vmem [shape: f32[1,1,18], index: 2, kind: input, shape index: {}]   ;;  %s3569_s3 = inlined_call_operand.vmem [shape: f32[18,18], index: 3, kind: input, shape index: {}]   ;;  %s3570_s4 = inlined_call_operand.hbm [shape: f32[1,2,8], index: 4, kind: input, shape index: {}]   ;;  %s3571_s5 = inlined_call_operand.hbm [shape: f32[8,8], index: 5, kind: input, shape index: {}]   ;;  %s3572_s6 = inlined_call_operand.vmem [shape: bf16[2,32,32], index: 6, kind: input, shape index: {}]   ;;  %s3573_s7 = inlined_call_operand.vmem [shape: f32[2,1,32], index: 7, kind: input, shape index: {}]   ;;  %s3574_s8 = inlined_call_operand.vmem [shape: bf16[1,32,96], index: 8, kind: input, shape index: {}]   ;;  %s3575_s9 = inlined_call_operand.vmem [shape: f32[1,1,96], index: 9, kind: input, shape index: {}]   ;;  %s3576_s10 = inlined_call_operand.vmem [shape: bf16[1,32,32], index: 10, kind: input, shape index: {}]   ;;  %s3577_s11 = inlined_call_operand.vmem [shape: f32[1,1,32], index: 11, kind: input, shape index: {}]   ;;  %s3578_s12 = inlined_call_operand.vmem [shape: f32[1,1,32], index: 12, kind: input, shape index: {}]   ;;  %s3579_s13 = inlined_call_operand.vmem [shape: f32[1,1,32], index: 13, kind: input, shape index: {}]   ;;  %s3580_s14 = inlined_call_operand.vmem [shape: bf16[1,32,128], index: 14, kind: input, shape index: {}]   ;;  %s3581_s15 = inlined_call_operand.vmem [shape: f32[1,1,128], index: 15, kind: input, shape index: {}]   ;;  %s3582_s16 = inlined_call_operand.vmem [shape: bf16[1,128,32], index: 16, kind: input, shape index: {}]   ;;  %s3583_s17 = inlined_call_operand.vmem [shape: f32[1,1,32], index: 17, kind: input, shape index: {}]   ;;  %s3584_s18 = inlined_call_operand.vmem [shape: f32[1,1,32], index: 18, kind: input, shape index: {}]   ;;  %s3585_s19 = inlined_call_operand.vmem [shape: f32[1,1,32], index: 19, kind: input, shape index: {}]   ;;  %s3586_s20 = inlined_call_operand.vmem [shape: bf16[2,32,32], index: 20, kind: input, shape index: {}]   ;;  %s3587_s21 = inlined_call_operand.vmem [shape: f32[2,1,32], index: 21, kind: input, shape index: {}]   ;;  %s3588_s22 = inlined_call_operand.vmem [shape: f32[1,32], index: 22, kind: input, shape index: {}]   ;;  %s3589_s23 = inlined_call_operand.<no memory space> [shape: f32[1,1], index: 23, kind: input, shape index: {}]   ;;  %s3590_s24 = inlined_call_operand.vmem [shape: bf16[32,64], index: 24, kind: input, shape index: {}]   ;;  %s3591_s25 = inlined_call_operand.vmem [shape: f32[1,64], index: 25, kind: input, shape index: {}]   ;;  %s3592_s26 = inlined_call_operand.hbm [shape: f32[1,2,128], index: 26, kind: output, shape index: {0}]   ;;  %s3593_s27 = inlined_call_operand.hbm [shape: f32[1,2,128], index: 27, kind: output, shape index: {1}]   ;;  %s3594_s28 = inlined_call_operand.vmem [shape: f32[1,18,64], index: 28, kind: output, shape index: {2}]  }
   0x1   :  { %3604 = sst [smem:[#allocation15_spill]] %s3566_s0  ;;  %v34_v0 = vstv %s3589_s23 }
   0x2   :  { %3605 = sst [smem:[#allocation16_spill]] %s3567_s1  ;;  %35 = vst [vmem:[#allocation2] sm:$0x1] %v34_v0 }
   0x3   :  { %3606 = sst [smem:[#allocation17_spill]] %s3568_s2 }
   0x4   :  { %3607 = sst [smem:[#allocation18_spill]] %s3569_s3 }
   0x5   :  { %3608 = sst [smem:[#allocation19_spill]] %s3570_s4 }
   0x6   :  { %3609 = sst [smem:[#allocation20_spill]] %s3571_s5 }
   0x7   :  { %3610 = sst [smem:[#allocation21_spill]] %s3572_s6 }
   0x8   :  { %3611 = sst [smem:[#allocation22_spill]] %s3573_s7 }
   0x9   :  { %3612 = sst [smem:[#allocation23_spill]] %s3574_s8 }
   0xa   :  { %3613 = sst [smem:[#allocation24_spill]] %s3575_s9 }
   0xb   :  { %3614 = sst [smem:[#allocation25_spill]] %s3576_s10 }
   0xc   :  { %3615 = sst [smem:[#allocation26_spill]] %s3577_s11 }
   0xd   :  { %3616 = sst [smem:[#allocation27_spill]] %s3578_s12 }
   0xe   :  { %36 = vsyncpa [#allocation4], 0 }
   0xf   :  { %37 = vsyncpa [#allocation7], 0 }
  0x10   :  { %38 = vsyncpa [#allocation5], 0 }
  0x11   :  { %39 = vsyncpa [#allocation10], 0  ;;  %s2786_s9 = smov [#allocation3]   ;;  %s2787_s3 = smov [#allocation6]  }
  0x12   :  { %s54_s30 = sshll.u32 %s2786_s9, 4  ;;  %s64_s6 = sshll.u32 %s2787_s3, 4  ;;  %s55_s30 = int_to_ptr.vmem [resolvable:$true] %s54_s30  ;;  %s65_s6 = int_to_ptr.vmem [resolvable:$true] %s64_s6 }
  0x13   :  { %s3617_s11 = sld [smem:[#allocation19_spill]] }
  0x19   :  { %s2690_s29 = scalar_lea.hbm %s3617_s11, 32 }
  0x1a   :  { %p2691_p0 = scmp.ne.s32.totalorder %s3617_s11, %s2690_s29  ;;  %p2694_p1 = scmp.lt.u32.totalorder %s2690_s29, %s3617_s11 }
  0x1c   :  { %p2696_p2 = pnand %p2694_p1, %p2691_p0 }
  0x1e   :  { %2699 = shalt.err (!%p2696_p2)
}
  0x1f   :  { %s2700_s1 = scalar_lea.vmem %s55_s30, 32  ;;  %p2705_p4 = scmp.lt.s32.totalorder %s55_s30, %s55_s30 }
  0x20   :  { %p2701_p3 = scmp.ne.s32.totalorder %s55_s30, %s2700_s1  ;;  %p2706_p5 = scmp.lt.s32.totalorder %s2700_s1, %s2700_s1 }
  0x22   :  { %p2707_p6 = por %p2706_p5, %p2705_p4 }
  0x24   :  { %p2708_p7 = pnand %p2707_p6, %p2701_p3 }
  0x26   :  { %2711 = shalt.err (!%p2708_p7)
}
  0x27   :  { %57 = dma.hbm_to_vmem [thread:$0]  %s3617_s11, 32, %s55_s30, [#allocation4]  }
  0x28   :  { %s3618_s3 = sld [smem:[#allocation20_spill]] }
  0x2e   :  { %s2712_s10 = scalar_lea.hbm %s3618_s3, 128 }
  0x2f   :  { %p2713_p8 = scmp.ne.s32.totalorder %s3618_s3, %s2712_s10  ;;  %p2716_p9 = scmp.lt.u32.totalorder %s2712_s10, %s3618_s3 }
  0x31   :  { %p2718_p10 = pnand %p2716_p9, %p2713_p8 }
  0x33   :  { %2721 = shalt.err (!%p2718_p10)
}
  0x34   :  { %s2722_s23 = scalar_lea.vmem %s65_s6, 128  ;;  %p2727_p12 = scmp.lt.s32.totalorder %s65_s6, %s65_s6 }
  0x35   :  { %p2723_p11 = scmp.ne.s32.totalorder %s65_s6, %s2722_s23  ;;  %p2728_p13 = scmp.lt.s32.totalorder %s2722_s23, %s2722_s23 }
  0x37   :  { %p2729_p0 = por %p2728_p13, %p2727_p12 }
  0x39   :  { %p2730_p1 = pnand %p2729_p0, %p2723_p11 }
  0x3b   :  { %2733 = shalt.err (!%p2730_p1)
}
  0x3c   :  { %67 = dma.hbm_to_vmem [thread:$0]  %s3618_s3, 128, %s65_s6, [#allocation7]  }
  0x3d   :  { %2778 = dma.done.wait [#allocation4], 32  }
  0x3e   :  { %2779 = vsyncadd [#allocation4], 4294967264 }
  0x3f   :  { %2780 = dma.done.wait [#allocation7], 128  }
  0x40   :  { %2781 = vsyncadd [#allocation7], 4294967168  ;;  %v2788_v1 = vmov 0   ;;  %s3619_s4 = sld [smem:[#allocation21_spill]]  ;;  %s3620_s0 = sld [smem:[#allocation15_spill]]  ;;  %vm159_vm0 = vcmask 261120  }
  0x41   :  { %2569 = vset.pattern.permute.xlu0 %v2788_v1  ;;  %2570 = vset.pattern.permute.xlu1 %v2788_v1  ;;  %s3621_s30 = sld [smem:[#allocation16_spill]]  ;;  %s3622_s2 = sld [smem:[#allocation22_spill]]  ;;  %vm555_vm11 = vcmask 146432   ;;  %vm562_vm12 = vcmask 140288   ;;  %vm699_vm14 = vcmask 1040384  }
  0x42   :  { %s3623_s7 = sld [smem:[#allocation23_spill]]  ;;  %s3624_s5 = sld [smem:[#allocation24_spill]] }
  0x43   :  { %s2789_s9 = smov 96   ;;  %s3631_s6 = sld [smem:[#allocation17_spill]] }
  0x44   :  { %s2790_s11 = smov 64   ;;  %s3635_s8 = sld [smem:[#allocation25_spill]] }
  0x45   :  { %s3636_s3 = sld [smem:[#allocation26_spill]]  ;;  %s2796_s1 = smov 24  }
  0x46   :  { %v2576_v2 = vld [vmem:[%s3619_s4] sm:$0xff]   ;;  %v2577_v3 = vld [vmem:[%s3619_s4 + $0x8] sm:$0xff]   ;;  %v117_v6 = vld [vmem:[%s3620_s0 + $0x10] sm:$0x3]  ;;  %s2800_s10 = smov 56  }
  0x47   :  { %2368 = vmatprep.subr.bf16.mxu0 %v2576_v2  ;;  %v115_v4 = vld [vmem:[%s3620_s0] sm:$0xff]  ;;  %v116_v5 = vld [vmem:[%s3620_s0 + $0x8] sm:$0xff]  ;;  %v120_v9 = vld [vmem:[%s3621_s30 + $0x10] sm:$0x3]  ;;  %v135_v11 = vpack.c.bf16 %v117_v6, %v117_v6 }
  0x48   :  { %2369 = vmatpush3.bf16.msra.mxu0 %v2576_v2  ;;  %v134_v7 = vpack.c.bf16 %v116_v5, %v115_v4  ;;  %v118_v8 = vld [vmem:[%s3621_s30] sm:$0xff]  ;;  %v119_v10 = vld [vmem:[%s3621_s30 + $0x8] sm:$0xff]  ;;  %253 = vperm.xlu1 %2570, %v120_v9   ;;  %v2578_v12 = vld [vmem:[%s3619_s4 + $0x10] sm:$0xff]  }
  0x49   :  { %2370 = vmatprep.subr.bf16.mxu0 %v2577_v3  ;;  %243 = vperm.xlu0 %2569, %v118_v8   ;;  %v2579_v13 = vld [vmem:[%s3619_s4 + $0x18] sm:$0xff]   ;;  %v2199_v14 = vld [vmem:[%s3622_s2] ss:$0 sm:$0xff]  ;;  %v2581_v58 = vld [vmem:[%s3623_s7 + $0x8] sm:$0xff]   ;;  %s3632_s4 = sld [smem:[#allocation18_spill]] }
  0x4a   :  { %2372 = vmatprep.mubr.msk.bf16.mxu0 %vm159_vm0, %v134_v7  ;;  %2376 = vmatprep.subr.bf16.mxu1 %v2578_v12  ;;  %v2580_v57 = vld [vmem:[%s3623_s7] sm:$0xff]  }
  0x4b   :  { %2377 = vmatpush3.bf16.msra.mxu1 %v2578_v12  ;;  %v2209_v59 = vld [vmem:[%s3622_s2 + $0x1] ss:$0 sm:$0xff] }
  0x4c   :  { %2371 = vmatpush3.bf16.msra.mxu0 %v2577_v3  ;;  %2378 = vmatprep.subr.bf16.mxu1 %v2579_v13 }
  0x4d   :  { %248 = vperm.xlu0 %2569, %v119_v10   ;;  %2384 = vmatprep.subr.bf16.mxu0 %v2580_v57 }
  0x4f   :  { %2373 = vmatmul.mubr.msk.bf16.vlgmr.msra.gmra.mrb[0].mxu0 %vm159_vm0, %v135_v11  ;;  %2379 = vmatpush3.bf16.msra.mxu1 %v2579_v13 }
  0x50   :  { %2385 = vmatpush3.bf16.msra.mxu0 %v2580_v57 }
  0x51   :  { %2386 = vmatprep.subr.bf16.mxu0 %v2581_v58 }
  0x54   :  { %2387 = vmatpush3.bf16.msra.mxu0 %v2581_v58 }
  0xc7   :  { %v3012_v47 = vpop.permute.xlu1 %253 }
  0xc8   :  { %v3010_v43 = vpop.permute.xlu0 %243 }
  0xcc   :  { %v3014_v51 = vpop.permute.xlu0 %248 }
 0x122   :  { %v2374_v15 = vpop.f32.mrb[0].mxu0 }
 0x123   :  { %v209_v16 = vadd.f32 %v2374_v15, %v2199_v14  ;;  %v200_v17 = vpop.f32.mrb[1].mxu0 }
 0x124   :  { %v201_v18 = vadd.f32 %v2199_v14, %v200_v17  ;;  %v2375_v19 = vpop.f32.mrb[2].mxu0 }
 0x125   :  { %v216_v20 = vmul.f32 %v209_v16, %v209_v16  ;;  %v203_v21 = vpop.f32.mrb[3].mxu0 }
 0x126   :  { %v214_v22 = vmul.f32 %v201_v18, %v201_v18  ;;  %v204_v23 = vadd.f32 %v2199_v14, %v203_v21 }
 0x127   :  { %v219_v24 = vmul.f32 %v216_v20, %v209_v16 }
 0x128   :  { %v217_v25 = vmul.f32 %v214_v22, %v201_v18  ;;  %v215_v26 = vmul.f32 %v204_v23, %v204_v23 }
 0x129   :  { %v222_v27 = vmul.f32 0.044715, %v219_v24 }
 0x12a   :  { %v220_v28 = vmul.f32 0.044715, %v217_v25  ;;  %v218_v29 = vmul.f32 %v215_v26, %v204_v23 }
 0x12b   :  { %v225_v30 = vadd.f32 %v222_v27, %v209_v16 }
 0x12c   :  { %v223_v31 = vadd.f32 %v220_v28, %v201_v18  ;;  %v221_v32 = vmul.f32 0.044715, %v218_v29 }
 0x12d   :  { %v228_v33 = vmul.f32 0.7978846, %v225_v30 }
 0x12e   :  { %v226_v34 = vmul.f32 0.7978846, %v223_v31  ;;  %v224_v35 = vadd.f32 %v221_v32, %v204_v23 }
 0x12f   :  { %2600 = vtanh.f32 %v228_v33 }
 0x130   :  { %2602 = vtanh.f32 %v226_v34  ;;  %v227_v36 = vmul.f32 0.7978846, %v224_v35  ;;  %v370_v35 = vlaneseq }
 0x132   :  { %2604 = vtanh.f32 %v227_v36  ;;  %v3046_v36 = vand.u32 127, %v370_v35 }
 0x134   :  { %vm375_vm1 = vcmp.ge.s32.totalorder %v3046_v36, 8  ;;  %vm376_vm2 = vcmp.lt.s32.totalorder %v3046_v36, 16  ;;  %vm378_vm3 = vcmp.ge.s32.totalorder %v3046_v36, 16  ;;  %vm379_vm4 = vcmp.lt.s32.totalorder %v3046_v36, 24 }
 0x135   :  { %vm381_vm5 = vcmp.ge.s32.totalorder %v3046_v36, 24  ;;  %vm382_vm6 = vcmp.lt.s32.totalorder %v3046_v36, 32  ;;  %vm3057_vm7 = vmand %vm375_vm1, %vm376_vm2  ;;  %vm373_vm9 = vcmp.lt.s32.totalorder %v3046_v36, 8 }
 0x136   :  { %vm3063_vm8 = vmand %vm378_vm3, %vm379_vm4  ;;  %vm1220_vm3 = vcmask 254976   ;;  %vm2792_vm4 = vmmov 0  }
 0x137   :  { %vm3070_vm10 = vmand %vm381_vm5, %vm382_vm6  ;;  %vm1653_vm5 = vcmask 517120   ;;  %vm1650_vm6 = vcmask 523264  }
 0x138   :  { %vm2223_vm13 = vmpackc.low %vm3057_vm7, %vm3057_vm7 }
 0x139   :  { %v2601_v37 = vpop.eup %2600  ;;  %vm3258_vm15 = vmpackc.low %vm373_vm9, %vm373_vm9 }
 0x13a   :  { %v2603_v38 = vpop.eup %2602  ;;  %v234_v39 = vadd.f32 1.0, %v2601_v37  ;;  %v2214_v37 = vld [vmem:[%s3624_s5] ss:$0 sm:$0xff]  ;;  %vm2235_vm1 = vmpackc.low %vm3063_vm8, %vm3063_vm8  ;;  %s2798_s5 = smov 40  }
 0x13b   :  { %v232_v40 = vadd.f32 1.0, %v2603_v38  ;;  %vm2242_vm2 = vmpackc.low %vm3070_vm10, %vm3070_vm10 }
 0x13c   :  { %v2605_v41 = vpop.eup %2604  ;;  %v237_v42 = vmul.f32 0.5, %v234_v39 }
 0x13d   :  { %v233_v44 = vadd.f32 1.0, %v2605_v41  ;;  %v235_v45 = vmul.f32 0.5, %v232_v40 }
 0x13e   :  { %v240_v46 = vmul.f32 %v237_v42, %v209_v16 }
 0x13f   :  { %v236_v48 = vmul.f32 0.5, %v233_v44  ;;  %v238_v49 = vmul.f32 %v235_v45, %v201_v18 }
 0x140   :  { %v258_v52 = vmul.f32 %v3012_v47, %v240_v46  ;;  %v2583_v46 = vld [vmem:[%s3635_s8 + $0x8] sm:$0xff]  }
 0x141   :  { %v239_v50 = vmul.f32 %v236_v48, %v204_v23  ;;  %v256_v53 = vmul.f32 %v3010_v43, %v238_v49 }
 0x142   :  { %v260_v56 = vpack.c.bf16 %v258_v52, %v258_v52 }
 0x143   :  { %v257_v54 = vmul.f32 %v3014_v51, %v239_v50 }
 0x145   :  { %v259_v55 = vpack.c.bf16 %v257_v54, %v256_v53 }
 0x147   :  { %2380 = vmatprep.mubr.msk.bf16.mxu1 %vm159_vm0, %v259_v55 }
 0x148   :  { %2381 = vmatmul.mubr.msk.bf16.vlgmr.msra.gmra.mrb[0].mxu1 %vm159_vm0, %v260_v56 }
 0x21b   :  { %v2382_v60 = vpop.f32.mrb[0].mxu1 }
 0x21c   :  { %v335_v61 = vadd.f32 %v2382_v60, %v2209_v59  ;;  %v326_v62 = vpop.f32.mrb[1].mxu1 }
 0x21d   :  { %v327_v63 = vadd.f32 %v2209_v59, %v326_v62  ;;  %v2383_v0 = vpop.f32.mrb[2].mxu1 }
 0x21e   :  { %v342_v1 = vmul.f32 %v335_v61, %v335_v61  ;;  %v329_v2 = vpop.f32.mrb[3].mxu1 }
 0x21f   :  { %v340_v3 = vmul.f32 %v327_v63, %v327_v63  ;;  %v330_v4 = vadd.f32 %v2209_v59, %v329_v2 }
 0x220   :  { %v345_v5 = vmul.f32 %v342_v1, %v335_v61 }
 0x221   :  { %v343_v6 = vmul.f32 %v340_v3, %v327_v63  ;;  %v341_v7 = vmul.f32 %v330_v4, %v330_v4 }
 0x222   :  { %v348_v8 = vmul.f32 0.044715, %v345_v5 }
 0x223   :  { %v346_v9 = vmul.f32 0.044715, %v343_v6  ;;  %v344_v10 = vmul.f32 %v341_v7, %v330_v4 }
 0x224   :  { %v351_v11 = vadd.f32 %v348_v8, %v335_v61 }
 0x225   :  { %v349_v12 = vadd.f32 %v346_v9, %v327_v63  ;;  %v347_v13 = vmul.f32 0.044715, %v344_v10 }
 0x226   :  { %v354_v14 = vmul.f32 0.7978846, %v351_v11 }
 0x227   :  { %v352_v15 = vmul.f32 0.7978846, %v349_v12  ;;  %v350_v16 = vadd.f32 %v347_v13, %v330_v4 }
 0x228   :  { %2606 = vtanh.f32 %v354_v14  ;;  %v2198_v14 = vld [vmem:[%s3631_s6] ss:$0 sm:$0xff] }
 0x229   :  { %2608 = vtanh.f32 %v352_v15  ;;  %v353_v17 = vmul.f32 0.7978846, %v350_v16  ;;  %v121_v15 = vld [vmem:[%s3632_s4] sm:$0xff]  ;;  %v122_v16 = vld [vmem:[%s3632_s4 + $0x8] sm:$0xff] }
 0x22b   :  { %2610 = vtanh.f32 %v353_v17  ;;  %v131_v17 = vadd.f32 %v2198_v14, %v121_v15 }
 0x232   :  { %v2607_v18 = vpop.eup %2606 }
 0x233   :  { %v2609_v19 = vpop.eup %2608  ;;  %v360_v20 = vadd.f32 1.0, %v2607_v18  ;;  %v123_v18 = vld [vmem:[%s3632_s4 + $0x10] sm:$0x3] }
 0x234   :  { %v358_v21 = vadd.f32 1.0, %v2609_v19 }
 0x235   :  { %v2611_v22 = vpop.eup %2610  ;;  %v363_v23 = vmul.f32 0.5, %v360_v20 }
 0x236   :  { %v361_v24 = vmul.f32 0.5, %v358_v21  ;;  %v359_v25 = vadd.f32 1.0, %v2611_v22  ;;  %v132_v21 = vadd.f32 %v2198_v14, %v122_v16 }
 0x237   :  { %v366_v26 = vmul.f32 %v363_v23, %v335_v61 }
 0x238   :  { %v364_v27 = vmul.f32 %v361_v24, %v327_v63  ;;  %v362_v28 = vmul.f32 0.5, %v359_v25  ;;  %v133_v24 = vadd.f32 %v2198_v14, %v123_v18 }
 0x239   :  { %v3031_v30 = vmul.f32 %v366_v26, %v3012_v47 }
 0x23a   :  { %v365_v29 = vmul.f32 %v362_v28, %v330_v4  ;;  %v3034_v31 = vmul.f32 %v364_v27, %v3010_v43 }
 0x23b   :  { %v385_v34 = vpack.c.bf16 %v3031_v30, %v3031_v30 }
 0x23c   :  { %v3037_v32 = vmul.f32 %v365_v29, %v3014_v51 }
 0x23e   :  { %v384_v33 = vpack.c.bf16 %v3037_v32, %v3034_v31 }
 0x240   :  { %2388 = vmatprep.mubr.msk.bf16.mxu0 %vm159_vm0, %v384_v33 }
 0x241   :  { %2389 = vmatmul.mubr.msk.bf16.vlgmr.msra.gmra.mrb[4].mxu0 %vm159_vm0, %v385_v34 }
 0x314   :  { %v2390_v38 = vpop.f32.mrb[4].mxu0 }
 0x315   :  { %v3061_v40 = vadd.f32 %v2390_v38, %v2214_v37  ;;  %v449_v41 = vpop.f32.mrb[5].mxu0 }
 0x316   :  { %v3067_v44 = vadd.f32 %v2214_v37, %v449_v41  ;;  %v2391_v45 = vpop.f32.mrb[6].mxu0 }
 0x317   :  { %v452_v48 = vpop.f32.mrb[7].mxu0  ;;  %v464_v49 = vpack.c.bf16 %v3061_v40, %v3061_v40  ;;  %v469_v6 = vsel %vm373_vm9, %v3061_v40, 0.0  ;;  %v596_v7 = vsel %vm3057_vm7, %v3061_v40, 0.0  ;;  %v812_v10 = vsel %vm3063_vm8, %v3061_v40, 0.0 }
 0x318   :  { %v3076_v50 = vadd.f32 %v2214_v37, %v452_v48  ;;  %v467_v52 = vsel %vm373_vm9, %v3067_v44, 0.0  ;;  %v594_v53 = vsel %vm3057_vm7, %v3067_v44, 0.0  ;;  %v810_v54 = vsel %vm3063_vm8, %v3067_v44, 0.0 }
 0x319   :  { %493 = vrot.lane.b32.xlu0 %v464_v49, %s2789_s9  ;;  %v971_v55 = vsel %vm3070_vm10, %v3067_v44, 0.0  ;;  %v471_v8 = vpack.c.bf16 %v469_v6, %v469_v6  ;;  %v598_v9 = vpack.c.bf16 %v596_v7, %v596_v7  ;;  %v814_v11 = vpack.c.bf16 %v812_v10, %v812_v10 }
 0x31a   :  { %v463_v56 = vpack.c.bf16 %v3076_v50, %v3067_v44  ;;  %v468_v57 = vsel %vm373_vm9, %v3076_v50, 0.0  ;;  %v595_v58 = vsel %vm3057_vm7, %v3076_v50, 0.0  ;;  %v811_v59 = vsel %vm3063_vm8, %v3076_v50, 0.0 }
 0x31b   :  { %v470_v60 = vpack.c.bf16 %v468_v57, %v467_v52  ;;  %v597_v61 = vpack.c.bf16 %v595_v58, %v594_v53  ;;  %v813_v62 = vpack.c.bf16 %v811_v59, %v810_v54  ;;  %v972_v63 = vsel %vm3070_vm10, %v3076_v50, 0.0 }
 0x31c   :  { %491 = vrot.lane.b32.xlu1 %v463_v56, %s2789_s9  ;;  %v974_v0 = vpack.c.bf16 %v972_v63, %v971_v55  ;;  %v2571_v1 = vpack.i.bf16 %v3076_v50, %v3067_v44  ;;  %v973_v12 = vsel %vm3070_vm10, %v3061_v40, 0.0 }
 0x31d   :  { %2396 = vmatprep.mubr.msk.bf16.mxu1 %vm159_vm0, %v470_v60  ;;  %2404 = vmatprep.mubr.msk.bf16.mxu0 %vm159_vm0, %v597_v61  ;;  %v975_v13 = vpack.c.bf16 %v973_v12, %v973_v12 }
 0x38b   :  { %v494_v4 = vpop.permute.xlu0 %493 }
 0x38c   :  { %v505_v5 = vsel %vm159_vm0, %v494_v4, 0 }
 0x38e   :  { %v492_v2 = vpop.permute.xlu1 %491 }
 0x38f   :  { %2540 = vmatprep.subr.msk.bf16.mxu1 %vm159_vm0, %v492_v2  ;;  %2542 = vmatprep.subr.msk.bf16.mxu0 %vm159_vm0, %v492_v2  ;;  %v502_v3 = vsel %vm159_vm0, %v492_v2, 0 }
 0x390   :  { %2393 = vmatpush3.bf16.xpose.msra.mxu1 %v502_v3  ;;  %2401 = vmatpush3.bf16.xpose.msra.mxu0 %v502_v3 }
 0x391   :  { %2541 = vmatprep.subr.msk.bf16.mxu1 %vm159_vm0, %v494_v4  ;;  %2543 = vmatprep.subr.msk.bf16.mxu0 %vm159_vm0, %v494_v4 }
 0x398   :  { %2395 = vmatpush3.bf16.xpose.msra.mxu1 %v505_v5  ;;  %2403 = vmatpush3.bf16.xpose.msra.mxu0 %v505_v5 }
 0x399   :  { %2546 = vmatprep.subr.msk.bf16.mxu0 %vm159_vm0, %v492_v2 }
 0x39f   :  { %2397 = vmatmul.mubr.msk.bf16.vlgmr.msra.gmra.mrb[4].mxu1 %vm159_vm0, %v471_v8  ;;  %2405 = vmatmul.mubr.msk.bf16.vlgmr.msra.gmra.mrb[8].mxu0 %vm159_vm0, %v598_v9 }
 0x3a0   :  { %2425 = vmatpush3.bf16.xpose.msra.mxu0 %v502_v3  ;;  %2428 = vmatprep.mubr.msk.bf16.mxu0 %vm159_vm0, %v813_v62 }
 0x3a1   :  { %2547 = vmatprep.subr.msk.bf16.mxu0 %vm159_vm0, %v494_v4 }
 0x3a8   :  { %2427 = vmatpush3.bf16.xpose.msra.mxu0 %v505_v5 }
 0x3a9   :  { %2549 = vmatprep.subr.msk.bf16.mxu0 %vm159_vm0, %v492_v2 }
 0x3af   :  { %2429 = vmatmul.mubr.msk.bf16.vlgmr.msra.gmra.mrb[12].mxu0 %vm159_vm0, %v814_v11 }
 0x3b0   :  { %2441 = vmatpush3.bf16.xpose.msra.mxu0 %v502_v3  ;;  %2444 = vmatprep.mubr.msk.bf16.mxu0 %vm159_vm0, %v974_v0 }
 0x3b1   :  { %2550 = vmatprep.subr.msk.bf16.mxu0 %vm159_vm0, %v494_v4 }
 0x3b8   :  { %2443 = vmatpush3.bf16.xpose.msra.mxu0 %v505_v5 }
 0x3bf   :  { %2445 = vmatmul.mubr.msk.bf16.vlgmr.msra.gmra.mrb[16].mxu0 %vm159_vm0, %v975_v13 }
 0x472   :  { %v2398_v19 = vpop.f32.mrb[4].mxu1  ;;  %v2406_v20 = vpop.f32.mrb[8].mxu0 }
 0x473   :  { %v541_v22 = vpop.f32.mrb[5].mxu1  ;;  %v644_v23 = vpop.f32.mrb[9].mxu0  ;;  %v653_v38 = vadd.f32 %v2406_v20, %v133_v24  ;;  %v550_v45 = vadd.f32 %v2398_v19, %v133_v24 }
 0x474   :  { %v645_v25 = vadd.f32 %v644_v23, %v131_v17  ;;  %v2399_v26 = vpop.f32.mrb[6].mxu1  ;;  %v2407_v27 = vpop.f32.mrb[10].mxu0  ;;  %v542_v33 = vadd.f32 %v541_v22, %v131_v17 }
 0x475   :  { %v544_v28 = vpop.f32.mrb[7].mxu1  ;;  %v647_v29 = vpop.f32.mrb[11].mxu0  ;;  %v664_v52 = vsel %vm562_vm12, %v653_v38, -inf  ;;  %v563_v53 = vsel %vm562_vm12, %v550_v45, -inf }
 0x476   :  { %v3150_v34 = vadd.f32 %v647_v29, %v132_v21  ;;  %v658_v37 = vsel %vm555_vm11, %v645_v25, -inf  ;;  %v556_v48 = vsel %vm555_vm11, %v542_v33, -inf  ;;  %v545_v49 = vadd.f32 %v544_v28, %v132_v21 }
 0x477   :  { %659 = vmax.xlane.f32.xlu1 %v658_v37 }
 0x478   :  { %v661_v41 = vsel %vm555_vm11, %v3150_v34, -inf  ;;  %v559_v54 = vsel %vm555_vm11, %v545_v49, -inf }
 0x479   :  { %662 = vmax.xlane.f32.xlu0 %v661_v41 }
 0x47b   :  { %557 = vmax.xlane.f32.xlu1 %v556_v48 }
 0x47d   :  { %665 = vmax.xlane.f32.xlu0 %v664_v52 }
 0x47f   :  { %564 = vmax.xlane.f32.xlu1 %v563_v53 }
 0x481   :  { %560 = vmax.xlane.f32.xlu0 %v559_v54 }
 0x482   :  { %v2430_v55 = vpop.f32.mrb[12].mxu0 }
 0x483   :  { %v860_v56 = vpop.f32.mrb[13].mxu0  ;;  %v3161_v60 = vadd.f32 %v2430_v55, %v133_v24 }
 0x484   :  { %v3159_v57 = vadd.f32 %v860_v56, %v131_v17  ;;  %v2431_v58 = vpop.f32.mrb[14].mxu0 }
 0x485   :  { %v863_v59 = vpop.f32.mrb[15].mxu0  ;;  %v880_v0 = vsel %vm562_vm12, %v3161_v60, -inf }
 0x486   :  { %v3163_v61 = vadd.f32 %v863_v59, %v132_v21  ;;  %v874_v62 = vsel %vm555_vm11, %v3159_v57, -inf }
 0x487   :  { %875 = vmax.xlane.f32.xlu0 %v874_v62 }
 0x488   :  { %v877_v63 = vsel %vm555_vm11, %v3163_v61, -inf }
 0x489   :  { %878 = vmax.xlane.f32.xlu1 %v877_v63 }
 0x48b   :  { %881 = vmax.xlane.f32.xlu0 %v880_v0 }
 0x492   :  { %v2446_v2 = vpop.f32.mrb[16].mxu0 }
 0x493   :  { %v1021_v3 = vpop.f32.mrb[17].mxu0  ;;  %v3173_v7 = vadd.f32 %v2446_v2, %v133_v24 }
 0x494   :  { %v3171_v4 = vadd.f32 %v1021_v3, %v131_v17  ;;  %v2447_v5 = vpop.f32.mrb[18].mxu0 }
 0x495   :  { %v1024_v6 = vpop.f32.mrb[19].mxu0  ;;  %v1041_v11 = vsel %vm562_vm12, %v3173_v7, -inf }
 0x496   :  { %v3175_v8 = vadd.f32 %v1024_v6, %v132_v21  ;;  %v1035_v9 = vsel %vm555_vm11, %v3171_v4, -inf }
 0x497   :  { %1036 = vmax.xlane.f32.xlu1 %v1035_v9 }
 0x498   :  { %v1038_v10 = vsel %vm555_vm11, %v3175_v8, -inf }
 0x499   :  { %1039 = vmax.xlane.f32.xlu0 %v1038_v10 }
 0x49b   :  { %1042 = vmax.xlane.f32.xlu1 %v1041_v11 }
 0x504   :  { %v660_v12 = vpop.xlane.xlu1 %659 }
 0x505   :  { %v667_v14 = vsub.f32 %v645_v25, %v660_v12 }
 0x506   :  { %v663_v13 = vpop.xlane.xlu0 %662 }
 0x507   :  { %v670_v19 = vmul.f32 1.442695, %v667_v14  ;;  %v668_v23 = vsub.f32 %v3150_v34, %v663_v13 }
 0x508   :  { %v558_v15 = vpop.xlane.xlu1 %557 }
 0x509   :  { %v566_v17 = vsub.f32 %v542_v33, %v558_v15  ;;  %v672_v37 = vmul.f32 1.442695, %v668_v23 }
 0x50a   :  { %v666_v16 = vpop.xlane.xlu0 %665 }
 0x50b   :  { %v669_v18 = vsub.f32 %v653_v38, %v666_v16  ;;  %v569_v26 = vmul.f32 1.442695, %v566_v17 }
 0x50c   :  { %v565_v20 = vpop.xlane.xlu1 %564 }
 0x50d   :  { %v674_v21 = vmul.f32 1.442695, %v669_v18  ;;  %v568_v22 = vsub.f32 %v550_v45, %v565_v20 }
 0x50e   :  { %v561_v24 = vpop.xlane.xlu0 %560 }
 0x50f   :  { %2612 = vpow2.f32 %v674_v21  ;;  %v573_v27 = vmul.f32 1.442695, %v568_v22  ;;  %v567_v28 = vsub.f32 %v545_v49, %v561_v24 }
 0x510   :  { %2614 = vpow2.f32 %v670_v19 }
 0x511   :  { %2616 = vpow2.f32 %v573_v27  ;;  %v571_v29 = vmul.f32 1.442695, %v567_v28 }
 0x512   :  { %2618 = vpow2.f32 %v569_v26 }
 0x513   :  { %2620 = vpow2.f32 %v571_v29 }
 0x514   :  { %2622 = vpow2.f32 %v672_v37  ;;  %v876_v56 = vpop.xlane.xlu0 %875 }
 0x515   :  { %v883_v0 = vsub.f32 %v3159_v57, %v876_v56 }
 0x516   :  { %v879_v58 = vpop.xlane.xlu1 %878 }
 0x517   :  { %v884_v59 = vsub.f32 %v3163_v61, %v879_v58  ;;  %v886_v6 = vmul.f32 1.442695, %v883_v0 }
 0x518   :  { %v882_v62 = vpop.xlane.xlu0 %881 }
 0x519   :  { %v3184_v25 = vpop.eup %2612  ;;  %v888_v2 = vmul.f32 1.442695, %v884_v59  ;;  %v885_v3 = vsub.f32 %v3161_v60, %v882_v62 }
 0x51a   :  { %v3186_v33 = vpop.eup %2614  ;;  %v682_v38 = vsel %vm562_vm12, %v3184_v25, 0.0 }
 0x51b   :  { %v3190_v34 = vpop.eup %2616  ;;  %683 = vadd.xlane.f32.xlu0 %v682_v38  ;;  %v676_v48 = vsel %vm555_vm11, %v3186_v33, 0.0  ;;  %2624 = vpow2.f32 %v888_v2  ;;  %v890_v10 = vmul.f32 1.442695, %v885_v3 }
 0x51c   :  { %v581_v41 = vsel %vm562_vm12, %v3190_v34, 0.0  ;;  %v3194_v45 = vpop.eup %2618  ;;  %2626 = vpow2.f32 %v886_v6 }
 0x51d   :  { %582 = vadd.xlane.f32.xlu1 %v581_v41  ;;  %v3198_v49 = vpop.eup %2620  ;;  %v575_v52 = vsel %vm555_vm11, %v3194_v45, 0.0  ;;  %2628 = vpow2.f32 %v890_v10 }
 0x51e   :  { %v3202_v53 = vpop.eup %2622  ;;  %v578_v54 = vsel %vm555_vm11, %v3198_v49, 0.0 }
 0x51f   :  { %677 = vadd.xlane.f32.xlu0 %v676_v48  ;;  %v679_v55 = vsel %vm555_vm11, %v3202_v53, 0.0 }
 0x521   :  { %576 = vadd.xlane.f32.xlu1 %v575_v52 }
 0x523   :  { %579 = vadd.xlane.f32.xlu0 %v578_v54 }
 0x524   :  { %v1037_v63 = vpop.xlane.xlu1 %1036 }
 0x525   :  { %680 = vadd.xlane.f32.xlu1 %v679_v55  ;;  %v1044_v9 = vsub.f32 %v3171_v4, %v1037_v63  ;;  %v3218_v11 = vpop.eup %2624 }
 0x526   :  { %v1040_v5 = vpop.xlane.xlu0 %1039  ;;  %v3220_v60 = vpop.eup %2626  ;;  %v895_v4 = vsel %vm555_vm11, %v3218_v11, 0.0 }
 0x527   :  { %v1045_v44 = vsub.f32 %v3175_v8, %v1040_v5  ;;  %v1047_v50 = vmul.f32 1.442695, %v1044_v9  ;;  %v3224_v12 = vpop.eup %2628  ;;  %v892_v8 = vsel %vm555_vm11, %v3220_v60, 0.0 }
 0x528   :  { %v898_v13 = vsel %vm562_vm12, %v3224_v12, 0.0 }
 0x529   :  { %v1049_v61 = vmul.f32 1.442695, %v1045_v44  ;;  %2630 = vpow2.f32 %v1047_v50 }
 0x52b   :  { %2632 = vpow2.f32 %v1049_v61 }
 0x536   :  { %479 = vrot.lane.b32.xlu1 %v3061_v40, %s2790_s11  ;;  %v1043_v40 = vpop.xlane.xlu1 %1042 }
 0x539   :  { %2572 = vrot.lane.b32.xlu0 %v2571_v1, %s2790_s11  ;;  %v1046_v1 = vsub.f32 %v3173_v7, %v1043_v40  ;;  %v3228_v7 = vpop.eup %2630 }
 0x53a   :  { %v3232_v14 = vpop.eup %2632  ;;  %v1053_v15 = vsel %vm555_vm11, %v3228_v7, 0.0 }
 0x53b   :  { %v1051_v57 = vmul.f32 1.442695, %v1046_v1  ;;  %v1056_v17 = vsel %vm555_vm11, %v3232_v14, 0.0 }
 0x53d   :  { %2634 = vpow2.f32 %v1051_v57 }
 0x547   :  { %v3236_v16 = vpop.eup %2634 }
 0x548   :  { %v1059_v18 = vsel %vm562_vm12, %v3236_v16, 0.0  ;;  %vm1976_vm12 = vcmask 64512  }
 0x558   :  { %896 = vadd.xlane.f32.xlu0 %v895_v4 }
 0x55a   :  { %893 = vadd.xlane.f32.xlu1 %v892_v8 }
 0x55c   :  { %899 = vadd.xlane.f32.xlu0 %v898_v13 }
 0x55e   :  { %1054 = vadd.xlane.f32.xlu1 %v1053_v15 }
 0x560   :  { %1057 = vadd.xlane.f32.xlu0 %v1056_v17 }
 0x562   :  { %1060 = vadd.xlane.f32.xlu1 %v1059_v18 }
 0x5a8   :  { %v684_v19 = vpop.xlane.xlu0 %683 }
 0x5a9   :  { %2636 = vrcp.f32 %v684_v19 }
 0x5aa   :  { %v583_v20 = vpop.xlane.xlu1 %582 }
 0x5ac   :  { %v678_v21 = vpop.xlane.xlu0 %677 }
 0x5ad   :  { %2638 = vrcp.f32 %v678_v21 }
 0x5ae   :  { %v577_v22 = vpop.xlane.xlu1 %576 }
 0x5b0   :  { %v580_v23 = vpop.xlane.xlu0 %579 }
 0x5b1   :  { %2640 = vrcp.f32 %v580_v23 }
 0x5b2   :  { %2642 = vrcp.f32 %v577_v22  ;;  %v681_v24 = vpop.xlane.xlu1 %680 }
 0x5b3   :  { %2644 = vrcp.f32 %v681_v24  ;;  %v2637_v48 = vpop.eup %2636  ;;  %v2582_v24 = vld [vmem:[%s3635_s8] sm:$0xff]   ;;  %s2797_s8 = smov 32  }
 0x5b4   :  { %v2573_v26 = vpop.permute.xlu0 %2572  ;;  %2646 = vrcp.f32 %v583_v20  ;;  %v690_v58 = vmul.f32 %v2637_v48, %v3184_v25 }
 0x5b5   :  { %v2575_v27 = vunpack.i.h.bf16 %v2573_v26  ;;  %v2574_v28 = vunpack.i.l.bf16 %v2573_v26 }
 0x5b6   :  { %v3242_v29 = vpop.permute.xlu1 %479  ;;  %v692_v5 = vpack.c.bf16 %v690_v58, %v690_v58 }
 0x5b7   :  { %v3247_v37 = vpack.c.bf16 %v2575_v27, %v2574_v28  ;;  %v601_v38 = vsel %vm3057_vm7, %v3242_v29, 0.0  ;;  %v2639_v52 = vpop.eup %2638  ;;  %v486_v2 = vsel %vm373_vm9, %v3242_v29, 0.0  ;;  %v978_v20 = vsel %vm3070_vm10, %v3242_v29, 0.0 }
 0x5b8   :  { %v603_v41 = vpack.c.bf16 %v601_v38, %v601_v38  ;;  %v688_v62 = vmul.f32 %v2639_v52, %v3186_v33  ;;  %v488_v33 = vpack.c.bf16 %v486_v2, %v486_v2  ;;  %v980_v23 = vpack.c.bf16 %v978_v20, %v978_v20 }
 0x5b9   :  { %2408 = vmatprep.subr.msk.bf16.mxu1 %vm2223_vm13, %v3247_v37 }
 0x5ba   :  { %2409 = vmatpush3.bf16.msk.msra.mxu1 %vm2223_vm13, %v3247_v37  ;;  %v701_v59 = vsel %vm699_vm14, %v603_v41, 0  ;;  %v1077_v27 = vsel %vm699_vm14, %v980_v23, 0  ;;  %vm1978_vm13 = vcmask 130048  }
 0x5bb   :  { %v2641_v54 = vpop.eup %2640  ;;  %2544 = vmatprep.subr.msk.bf16.mxu1 %vm699_vm14, %v603_v41 }
 0x5bc   :  { %v2643_v55 = vpop.eup %2642  ;;  %v588_v0 = vmul.f32 %v2641_v54, %v3198_v49 }
 0x5bd   :  { %v2645_v39 = vpop.eup %2644  ;;  %v587_v25 = vmul.f32 %v2643_v55, %v3194_v45  ;;  %v758_v45 = vsel %vm699_vm14, %v488_v33, 0 }
 0x5be   :  { %2411 = vmatpush3.bf16.msra.mxu1 %v701_v59  ;;  %v689_v63 = vmul.f32 %v2645_v39, %v3202_v53  ;;  %v2647_v36 = vpop.eup %2646  ;;  %v817_v53 = vsel %vm3063_vm8, %v3242_v29, 0.0 }
 0x5bf   :  { %2416 = vmatprep.subr.msk.bf16.mxu1 %vm3258_vm15, %v3247_v37  ;;  %v590_v6 = vpack.c.bf16 %v588_v0, %v587_v25  ;;  %v589_v49 = vmul.f32 %v2647_v36, %v3190_v34  ;;  %v819_v40 = vpack.c.bf16 %v817_v53, %v817_v53 }
 0x5c0   :  { %v691_v3 = vpack.c.bf16 %v689_v63, %v688_v62 }
 0x5c1   :  { %v591_v9 = vpack.c.bf16 %v589_v49, %v589_v49  ;;  %v916_v34 = vsel %vm699_vm14, %v819_v40, 0 }
 0x5c2   :  { %2412 = vmatprep.mubr.msk.bf16.mxu1 %vm555_vm11, %v691_v3 }
 0x5c3   :  { %2413 = vmatmul.mubr.msk.bf16.vlgmr.msra.gmra.mrb[8].mxu1 %vm555_vm11, %v692_v5 }
 0x5c4   :  { %2417 = vmatpush3.bf16.msk.msra.mxu1 %vm3258_vm15, %v3247_v37  ;;  %2420 = vmatprep.mubr.msk.bf16.mxu1 %vm555_vm11, %v590_v6  ;;  %vm1980_vm15 = vcmask 195584  }
 0x5c5   :  { %2545 = vmatprep.subr.msk.bf16.mxu1 %vm699_vm14, %v488_v33 }
 0x5c8   :  { %2419 = vmatpush3.bf16.msra.mxu1 %v758_v45 }
 0x5c9   :  { %2432 = vmatprep.subr.msk.bf16.mxu1 %vm2235_vm1, %v3247_v37 }
 0x5cf   :  { %2421 = vmatmul.mubr.msk.bf16.vlgmr.msra.gmra.mrb[8].mxu1 %vm555_vm11, %v591_v9 }
 0x5d0   :  { %2433 = vmatpush3.bf16.msk.msra.mxu1 %vm2235_vm1, %v3247_v37  ;;  %vm1983_vm1 = vcmask 326656  }
 0x5d1   :  { %2548 = vmatprep.subr.msk.bf16.mxu1 %vm699_vm14, %v819_v40 }
 0x5d4   :  { %2435 = vmatpush3.bf16.msra.mxu1 %v916_v34 }
 0x5d5   :  { %2448 = vmatprep.subr.msk.bf16.mxu1 %vm2242_vm2, %v3247_v37 }
 0x5e5   :  { %v897_v42 = vpop.xlane.xlu0 %896 }
 0x5e6   :  { %2648 = vrcp.f32 %v897_v42 }
 0x5e7   :  { %v894_v10 = vpop.xlane.xlu1 %893 }
 0x5e8   :  { %2650 = vrcp.f32 %v894_v10 }
 0x5e9   :  { %v900_v44 = vpop.xlane.xlu0 %899 }
 0x5ea   :  { %2652 = vrcp.f32 %v900_v44  ;;  %v2584_v44 = vld [vmem:[%s3580_s14] sm:$0xff]  }
 0x5eb   :  { %v1055_v50 = vpop.xlane.xlu1 %1054  ;;  %2464 = vmatprep.subr.bf16.mxu0 %v2584_v44 }
 0x5ec   :  { %2654 = vrcp.f32 %v1055_v50  ;;  %v2585_v50 = vld [vmem:[%s3580_s14 + $0x8] sm:$0xff]   ;;  %2465 = vmatpush3.bf16.msra.mxu0 %v2584_v44  ;;  %s3637_s14 = sld [smem:[#allocation27_spill]] }
 0x5ed   :  { %v1058_v1 = vpop.xlane.xlu0 %1057  ;;  %2466 = vmatprep.subr.bf16.mxu0 %v2585_v50 }
 0x5ee   :  { %2656 = vrcp.f32 %v1058_v1 }
 0x5ef   :  { %v1061_v61 = vpop.xlane.xlu1 %1060 }
 0x5f0   :  { %v2649_v57 = vpop.eup %2648  ;;  %2658 = vrcp.f32 %v1061_v61  ;;  %2467 = vmatpush3.bf16.msra.mxu0 %v2585_v50 }
 0x5f1   :  { %v905_v13 = vmul.f32 %v2649_v57, %v3218_v11 }
 0x5f2   :  { %v2651_v4 = vpop.eup %2650  ;;  %v2252_v20 = vld [vmem:[%s3637_s14] ss:$0 sm:$0xff] }
 0x5f3   :  { %v904_v8 = vmul.f32 %v2651_v4, %v3220_v60 }
 0x5f4   :  { %v2653_v15 = vpop.eup %2652 }
 0x5f5   :  { %v906_v17 = vmul.f32 %v2653_v15, %v3224_v12  ;;  %v907_v18 = vpack.c.bf16 %v905_v13, %v904_v8 }
 0x5f6   :  { %v2655_v19 = vpop.eup %2654 }
 0x5f7   :  { %2436 = vmatprep.mubr.msk.bf16.mxu1 %vm555_vm11, %v907_v18  ;;  %v908_v21 = vpack.c.bf16 %v906_v17, %v906_v17  ;;  %v1065_v60 = vmul.f32 %v2655_v19, %v3228_v7 }
 0x5f8   :  { %v2657_v22 = vpop.eup %2656 }
 0x5f9   :  { %2437 = vmatmul.mubr.msk.bf16.vlgmr.msra.gmra.mrb[8].mxu1 %vm555_vm11, %v908_v21  ;;  %v1066_v11 = vmul.f32 %v2657_v22, %v3232_v14 }
 0x5fa   :  { %2449 = vmatpush3.bf16.msk.msra.mxu1 %vm2242_vm2, %v3247_v37  ;;  %v2659_v26 = vpop.eup %2658  ;;  %vm1985_vm2 = vcmask 392192  }
 0x5fb   :  { %2551 = vmatprep.subr.msk.bf16.mxu1 %vm699_vm14, %v980_v23  ;;  %v1068_v12 = vpack.c.bf16 %v1066_v11, %v1065_v60  ;;  %v1067_v7 = vmul.f32 %v2659_v26, %v3236_v16  ;;  %v2247_v16 = vld [vmem:[%s3636_s3] ss:$0 sm:$0xff] }
 0x5fc   :  { %v2253_v23 = vld [vmem:[%s3579_s13] ss:$0 sm:$0xff] }
 0x5fd   :  { %2452 = vmatprep.mubr.msk.bf16.mxu1 %vm555_vm11, %v1068_v12  ;;  %v1069_v14 = vpack.c.bf16 %v1067_v7, %v1067_v7 }
 0x5fe   :  { %2451 = vmatpush3.bf16.msra.mxu1 %v1077_v27 }
 0x5ff   :  { %2456 = vmatprep.subr.bf16.mxu1 %v2582_v24 }
 0x605   :  { %2453 = vmatmul.mubr.msk.bf16.vlgmr.msra.gmra.mrb[8].mxu1 %vm555_vm11, %v1069_v14  ;;  %vm1941_vm11 = vcmask 1045504  }
 0x606   :  { %2457 = vmatpush3.bf16.msra.mxu1 %v2582_v24 }
 0x607   :  { %2458 = vmatprep.subr.bf16.mxu1 %v2583_v46 }
 0x60a   :  { %2459 = vmatpush3.bf16.msra.mxu1 %v2583_v46 }
 0x6d8   :  { %v2454_v28 = vpop.f32.mrb[8].mxu1 }
 0x6d9   :  { %v1113_v29 = vpop.f32.mrb[9].mxu1  ;;  %v1131_v48 = vpack.c.bf16 %v2454_v28, %v2454_v28 }
 0x6da   :  { %v2455_v37 = vpop.f32.mrb[10].mxu1 }
 0x6db   :  { %v1116_v38 = vpop.f32.mrb[11].mxu1 }
 0x6dc   :  { %v1130_v41 = vpack.c.bf16 %v1116_v38, %v1113_v29 }
 0x6de   :  { %2460 = vmatprep.mubr.msk.bf16.mxu1 %vm159_vm0, %v1130_v41 }
 0x6df   :  { %2461 = vmatmul.mubr.msk.bf16.vlgmr.msra.gmra.mrb[12].mxu1 %vm159_vm0, %v1131_v48  ;;  %v2586_v48 = vld [vmem:[%s3582_s16] sm:$0xff]  }
 0x6e0   :  { %2472 = vmatprep.subr.bf16.mxu1 %v2586_v48 }
 0x6e1   :  { %2473 = vmatpush3.bf16.msra.mxu1 %v2586_v48 }
 0x7b2   :  { %v2462_v52 = vpop.f32.mrb[12].mxu1 }
 0x7b3   :  { %v1195_v54 = vpop.f32.mrb[13].mxu1  ;;  %v1204_v55 = vadd.f32 %v2462_v52, %v2247_v16  ;;  %v2588_v52 = vld [vmem:[%s3582_s16 + $0x10] sm:$0xff]  }
 0x7b4   :  { %v1196_v56 = vadd.f32 %v2247_v16, %v1195_v54  ;;  %v2463_v39 = vpop.f32.mrb[14].mxu1  ;;  %v2589_v54 = vld [vmem:[%s3582_s16 + $0x18] sm:$0xff]  }
 0x7b5   :  { %v1198_v58 = vpop.f32.mrb[15].mxu1  ;;  %v1211_v2 = vadd.f32 %v1204_v55, %v3031_v30  ;;  %v2590_v55 = vld [vmem:[%s3582_s16 + $0x20] sm:$0xff]   ;;  %v2592_v39 = vld [vmem:[%s3582_s16 + $0x30] sm:$0xff]  }
 0x7b6   :  { %v1199_v59 = vadd.f32 %v2247_v16, %v1198_v58  ;;  %v1209_v62 = vadd.f32 %v1196_v56, %v3034_v31  ;;  %v2587_v16 = vld [vmem:[%s3582_s16 + $0x8] sm:$0xff]   ;;  %v2593_v58 = vld [vmem:[%s3582_s16 + $0x38] sm:$0xff]  }
 0x7b7   :  { %v1221_v25 = vsel %vm1220_vm3, %v1211_v2, 0.0  ;;  %2474 = vmatprep.subr.bf16.mxu1 %v2587_v16  ;;  %v2591_v56 = vld [vmem:[%s3582_s16 + $0x28] sm:$0xff]  }
 0x7b8   :  { %v1214_v63 = vsel %vm159_vm0, %v1209_v62, 0.0  ;;  %v1210_v0 = vadd.f32 %v1199_v59, %v3037_v32  ;;  %2475 = vmatpush3.bf16.msra.mxu1 %v2587_v16  ;;  %v2254_v59 = vld [vmem:[%s3581_s15] ss:$0 sm:$0xff] }
 0x7b9   :  { %1215 = vadd.xlane.f32.xlu0 %v1214_v63  ;;  %2476 = vmatprep.subr.bf16.mxu1 %v2588_v52 }
 0x7ba   :  { %v1217_v3 = vsel %vm159_vm0, %v1210_v0, 0.0 }
 0x7bb   :  { %1218 = vadd.xlane.f32.xlu1 %v1217_v3 }
 0x7bc   :  { %2477 = vmatpush3.bf16.msra.mxu1 %v2588_v52 }
 0x7bd   :  { %1222 = vadd.xlane.f32.xlu0 %v1221_v25  ;;  %2478 = vmatprep.subr.bf16.mxu1 %v2589_v54 }
 0x7c0   :  { %2479 = vmatpush3.bf16.msra.mxu1 %v2589_v54 }
 0x7c1   :  { %2480 = vmatprep.subr.bf16.mxu1 %v2590_v55 }
 0x7c4   :  { %2481 = vmatpush3.bf16.msra.mxu1 %v2590_v55 }
 0x7c5   :  { %2482 = vmatprep.subr.bf16.mxu1 %v2591_v56 }
 0x7c8   :  { %2483 = vmatpush3.bf16.msra.mxu1 %v2591_v56 }
 0x7c9   :  { %2484 = vmatprep.subr.bf16.mxu1 %v2592_v39 }
 0x7cc   :  { %2485 = vmatpush3.bf16.msra.mxu1 %v2592_v39 }
 0x7cd   :  { %2486 = vmatprep.subr.bf16.mxu1 %v2593_v58 }
 0x7d0   :  { %2487 = vmatpush3.bf16.msra.mxu1 %v2593_v58 }
 0x846   :  { %v1216_v5 = vpop.xlane.xlu0 %1215 }
 0x847   :  { %v1225_v6 = vmul.f32 0.03125, %v1216_v5 }
 0x848   :  { %v1219_v33 = vpop.xlane.xlu1 %1218 }
 0x849   :  { %v1228_v36 = vsub.f32 %v1209_v62, %v1225_v6  ;;  %v1226_v45 = vmul.f32 0.03125, %v1219_v33 }
 0x84a   :  { %v1223_v31 = vpop.xlane.xlu0 %1222 }
 0x84b   :  { %v1229_v49 = vsub.f32 %v1210_v0, %v1226_v45  ;;  %v1227_v53 = vmul.f32 0.03125, %v1223_v31  ;;  %v1231_v9 = vmul.f32 %v1228_v36, %v1228_v36 }
 0x84d   :  { %v1230_v32 = vsub.f32 %v1211_v2, %v1227_v53  ;;  %v1234_v30 = vsel %vm159_vm0, %v1231_v9, 0.0  ;;  %v1232_v40 = vmul.f32 %v1229_v49, %v1229_v49 }
 0x84e   :  { %1235 = vadd.xlane.f32.xlu1 %v1234_v30 }
 0x84f   :  { %v1237_v34 = vsel %vm159_vm0, %v1232_v40, 0.0  ;;  %v1233_v42 = vmul.f32 %v1230_v32, %v1230_v32 }
 0x850   :  { %1238 = vadd.xlane.f32.xlu0 %v1237_v34 }
 0x851   :  { %v1240_v10 = vsel %vm1220_vm3, %v1233_v42, 0.0 }
 0x852   :  { %1241 = vadd.xlane.f32.xlu1 %v1240_v10 }
 0x8db   :  { %v1236_v1 = vpop.xlane.xlu1 %1235 }
 0x8dc   :  { %v1243_v61 = vmul.f32 0.03125, %v1236_v1 }
 0x8dd   :  { %v1239_v57 = vpop.xlane.xlu0 %1238 }
 0x8de   :  { %v1246_v4 = vadd.f32 1e-05, %v1243_v61  ;;  %v1244_v8 = vmul.f32 0.03125, %v1239_v57 }
 0x8df   :  { %v1242_v13 = vpop.xlane.xlu1 %1241 }
 0x8e0   :  { %2660 = vrsqrt.f32 %v1246_v4  ;;  %v1247_v15 = vadd.f32 1e-05, %v1244_v8  ;;  %v1245_v17 = vmul.f32 0.03125, %v1242_v13 }
 0x8e2   :  { %2662 = vrsqrt.f32 %v1247_v15  ;;  %v1248_v18 = vadd.f32 1e-05, %v1245_v17 }
 0x8e4   :  { %2664 = vrsqrt.f32 %v1248_v18 }
 0x8ea   :  { %v2661_v19 = vpop.eup %2660 }
 0x8eb   :  { %v1252_v21 = vmul.f32 %v2661_v19, %v1228_v36 }
 0x8ec   :  { %v2663_v22 = vpop.eup %2662 }
 0x8ed   :  { %v1253_v60 = vmul.f32 %v2663_v22, %v1229_v49  ;;  %v1261_v11 = vmul.f32 %v2252_v20, %v1252_v21 }
 0x8ee   :  { %v2665_v12 = vpop.eup %2664 }
 0x8ef   :  { %v1254_v24 = vmul.f32 %v2665_v12, %v1230_v32  ;;  %v1262_v26 = vmul.f32 %v2252_v20, %v1253_v60  ;;  %v1270_v27 = vadd.f32 %v2253_v23, %v1261_v11 }
 0x8f1   :  { %v1263_v7 = vmul.f32 %v2252_v20, %v1254_v24  ;;  %v1271_v14 = vadd.f32 %v2253_v23, %v1262_v26  ;;  %v3357_v46 = vmul.f32 %v1270_v27, %v3010_v43 }
 0x8f3   :  { %v3360_v28 = vmul.f32 %v1271_v14, %v3014_v51  ;;  %v1272_v29 = vadd.f32 %v2253_v23, %v1263_v7  ;;  %v2259_v23 = vld [vmem:[%s3583_s17] ss:$0 sm:$0xff] }
 0x8f5   :  { %v1276_v37 = vpack.c.bf16 %v3360_v28, %v3357_v46  ;;  %v3365_v38 = vmul.f32 %v1272_v29, %v3012_v47 }
 0x8f7   :  { %2468 = vmatprep.mubr.msk.bf16.mxu0 %vm159_vm0, %v1276_v37  ;;  %v1277_v41 = vpack.c.bf16 %v3365_v38, %v3365_v38 }
 0x8f9   :  { %2469 = vmatmul.mubr.msk.bf16.vlgmr.msra.gmra.mrb[20].mxu0 %vm159_vm0, %v1277_v41 }
 0x9cc   :  { %v2470_v62 = vpop.f32.mrb[20].mxu0 }
 0x9cd   :  { %v1350_v63 = vadd.f32 %v2470_v62, %v2254_v59  ;;  %v1341_v0 = vpop.f32.mrb[21].mxu0 }
 0x9ce   :  { %v1342_v2 = vadd.f32 %v2254_v59, %v1341_v0  ;;  %v2471_v3 = vpop.f32.mrb[22].mxu0 }
 0x9cf   :  { %v1357_v25 = vmul.f32 %v1350_v63, %v1350_v63  ;;  %v1344_v5 = vpop.f32.mrb[23].mxu0 }
 0x9d0   :  { %v1355_v6 = vmul.f32 %v1342_v2, %v1342_v2  ;;  %v1345_v33 = vadd.f32 %v2254_v59, %v1344_v5  ;;  %v2595_v5 = vld [vmem:[%s3590_s24 + $0x8] sm:$0xff]  }
 0x9d1   :  { %v1360_v36 = vmul.f32 %v1357_v25, %v1350_v63  ;;  %v2594_v25 = vld [vmem:[%s3590_s24] sm:$0xff]   ;;  %s2799_s24 = smov 48  }
 0x9d2   :  { %v1358_v45 = vmul.f32 %v1355_v6, %v1342_v2  ;;  %v1356_v31 = vmul.f32 %v1345_v33, %v1345_v33  ;;  %2492 = vmatprep.subr.bf16.mxu0 %v2594_v25  ;;  %v2791_v6 = vmov 0.0  }
 0x9d3   :  { %v1363_v49 = vmul.f32 0.044715, %v1360_v36  ;;  %2493 = vmatpush3.bf16.msra.mxu0 %v2594_v25  ;;  %2522 = vmatprep.subr.bf16.mxu1 %v2791_v6 }
 0x9d4   :  { %v1361_v53 = vmul.f32 0.044715, %v1358_v45  ;;  %v1359_v9 = vmul.f32 %v1356_v31, %v1345_v33  ;;  %2494 = vmatprep.subr.bf16.mxu0 %v2595_v5 }
 0x9d5   :  { %v1366_v32 = vadd.f32 %v1363_v49, %v1350_v63 }
 0x9d6   :  { %v1364_v30 = vadd.f32 %v1361_v53, %v1342_v2  ;;  %v1362_v40 = vmul.f32 0.044715, %v1359_v9 }
 0x9d7   :  { %v1369_v34 = vmul.f32 0.7978846, %v1366_v32  ;;  %2495 = vmatpush3.bf16.msra.mxu0 %v2595_v5 }
 0x9d8   :  { %v1367_v42 = vmul.f32 0.7978846, %v1364_v30  ;;  %v1365_v10 = vadd.f32 %v1362_v40, %v1345_v33  ;;  %2500 = vmatprep.subr.bf16.mxu0 %v2791_v6 }
 0x9d9   :  { %2666 = vtanh.f32 %v1369_v34  ;;  %v2268_v34 = vld [vmem:[%s3584_s18] ss:$0 sm:$0xff] }
 0x9da   :  { %2668 = vtanh.f32 %v1367_v42  ;;  %v1368_v44 = vmul.f32 0.7978846, %v1365_v10 }
 0x9dc   :  { %2670 = vtanh.f32 %v1368_v44  ;;  %v2269_v44 = vld [vmem:[%s3585_s19] ss:$0 sm:$0xff] }
 0x9e3   :  { %v2667_v50 = vpop.eup %2666 }
 0x9e4   :  { %v2669_v1 = vpop.eup %2668  ;;  %v1375_v61 = vadd.f32 1.0, %v2667_v50 }
 0x9e5   :  { %v1373_v57 = vadd.f32 1.0, %v2669_v1 }
 0x9e6   :  { %v2671_v4 = vpop.eup %2670  ;;  %v1378_v8 = vmul.f32 0.5, %v1375_v61 }
 0x9e7   :  { %v1374_v13 = vadd.f32 1.0, %v2671_v4  ;;  %v1376_v15 = vmul.f32 0.5, %v1373_v57 }
 0x9e8   :  { %v1381_v18 = vmul.f32 %v1378_v8, %v1350_v63 }
 0x9e9   :  { %v1377_v17 = vmul.f32 0.5, %v1374_v13  ;;  %v1379_v19 = vmul.f32 %v1376_v15, %v1342_v2 }
 0x9ea   :  { %v1383_v22 = vpack.c.bf16 %v1381_v18, %v1381_v18 }
 0x9eb   :  { %v1380_v20 = vmul.f32 %v1377_v17, %v1345_v33 }
 0x9ed   :  { %v1382_v21 = vpack.c.bf16 %v1380_v20, %v1379_v19 }
 0x9ef   :  { %2488 = vmatprep.mubr.bf16.mxu1 %v1382_v21 }
 0x9f0   :  { %2489 = vmatmul.mubr.bf16.vlgmr.msra.gmra.mrb[16].mxu1 %v1383_v22  ;;  %v2596_v22 = vld [vmem:[%s3586_s20] sm:$0xff]  }
 0x9f1   :  { %2524 = vmatprep.mubr.msk.bf16.mxu1 %vm2792_vm4, %v2791_v6 }
 0xac3   :  { %v2490_v60 = vpop.f32.mrb[16].mxu1 }
 0xac4   :  { %v1489_v11 = vpop.f32.mrb[17].mxu1  ;;  %v1498_v12 = vadd.f32 %v2490_v60, %v2259_v23  ;;  %v2597_v60 = vld [vmem:[%s3586_s20 + $0x8] sm:$0xff]  }
 0xac5   :  { %v1490_v24 = vadd.f32 %v2259_v23, %v1489_v11  ;;  %v2491_v26 = vpop.f32.mrb[18].mxu1 }
 0xac6   :  { %v1492_v27 = vpop.f32.mrb[19].mxu1  ;;  %v1505_v41 = vadd.f32 %v1498_v12, %v3365_v38  ;;  %v2598_v12 = vld [vmem:[%s3586_s20 + $0x10] sm:$0xff]   ;;  %v2270_v26 = vld [vmem:[%s3591_s25] ss:$0 sm:$0xff] }
 0xac7   :  { %v1493_v7 = vadd.f32 %v2259_v23, %v1492_v27  ;;  %v1503_v14 = vadd.f32 %v1490_v24, %v3357_v46  ;;  %v2599_v24 = vld [vmem:[%s3586_s20 + $0x18] sm:$0xff]  }
 0xac8   :  { %v1514_v16 = vsel %vm1220_vm3, %v1505_v41, 0.0 }
 0xac9   :  { %v1508_v29 = vsel %vm159_vm0, %v1503_v14, 0.0  ;;  %v1504_v37 = vadd.f32 %v1493_v7, %v3360_v28 }
 0xaca   :  { %1509 = vadd.xlane.f32.xlu0 %v1508_v29 }
 0xacb   :  { %v1511_v48 = vsel %vm159_vm0, %v1504_v37, 0.0 }
 0xacc   :  { %1512 = vadd.xlane.f32.xlu1 %v1511_v48 }
 0xace   :  { %1515 = vadd.xlane.f32.xlu0 %v1514_v16 }
 0xb57   :  { %v1510_v52 = vpop.xlane.xlu0 %1509 }
 0xb58   :  { %v1517_v54 = vmul.f32 0.03125, %v1510_v52 }
 0xb59   :  { %v1513_v55 = vpop.xlane.xlu1 %1512 }
 0xb5a   :  { %v1520_v56 = vsub.f32 %v1503_v14, %v1517_v54  ;;  %v1518_v39 = vmul.f32 0.03125, %v1513_v55  ;;  %v2275_v55 = vld [vmem:[%s3587_s21] ss:$0 sm:$0xff] }
 0xb5b   :  { %v1516_v58 = vpop.xlane.xlu0 %1515 }
 0xb5c   :  { %v1521_v46 = vsub.f32 %v1504_v37, %v1518_v39  ;;  %v1519_v59 = vmul.f32 0.03125, %v1516_v58  ;;  %v1523_v62 = vmul.f32 %v1520_v56, %v1520_v56 }
 0xb5e   :  { %v1522_v63 = vsub.f32 %v1505_v41, %v1519_v59  ;;  %v1526_v28 = vsel %vm159_vm0, %v1523_v62, 0.0  ;;  %v1524_v38 = vmul.f32 %v1521_v46, %v1521_v46 }
 0xb5f   :  { %1527 = vadd.xlane.f32.xlu1 %v1526_v28 }
 0xb60   :  { %v1529_v0 = vsel %vm159_vm0, %v1524_v38, 0.0  ;;  %v1525_v2 = vmul.f32 %v1522_v63, %v1522_v63 }
 0xb61   :  { %1530 = vadd.xlane.f32.xlu0 %v1529_v0 }
 0xb62   :  { %v1532_v3 = vsel %vm1220_vm3, %v1525_v2, 0.0 }
 0xb63   :  { %1533 = vadd.xlane.f32.xlu1 %v1532_v3 }
 0xbec   :  { %v1528_v33 = vpop.xlane.xlu1 %1527 }
 0xbed   :  { %v1535_v36 = vmul.f32 0.03125, %v1528_v33 }
 0xbee   :  { %v1531_v45 = vpop.xlane.xlu0 %1530 }
 0xbef   :  { %v1538_v31 = vadd.f32 1e-05, %v1535_v36  ;;  %v1536_v49 = vmul.f32 0.03125, %v1531_v45 }
 0xbf0   :  { %v1534_v53 = vpop.xlane.xlu1 %1533 }
 0xbf1   :  { %2672 = vrsqrt.f32 %v1538_v31  ;;  %v1539_v9 = vadd.f32 1e-05, %v1536_v49  ;;  %v1537_v32 = vmul.f32 0.03125, %v1534_v53 }
 0xbf3   :  { %2674 = vrsqrt.f32 %v1539_v9  ;;  %v1540_v30 = vadd.f32 1e-05, %v1537_v32 }
 0xbf5   :  { %2676 = vrsqrt.f32 %v1540_v30 }
 0xbfb   :  { %v2673_v40 = vpop.eup %2672 }
 0xbfc   :  { %v1544_v42 = vmul.f32 %v2673_v40, %v1520_v56 }
 0xbfd   :  { %v2675_v10 = vpop.eup %2674 }
 0xbfe   :  { %v1553_v50 = vmul.f32 %v2268_v34, %v1544_v42  ;;  %v1545_v1 = vmul.f32 %v2675_v10, %v1521_v46 }
 0xbff   :  { %v2677_v61 = vpop.eup %2676 }
 0xc00   :  { %v1546_v57 = vmul.f32 %v2677_v61, %v1522_v63  ;;  %v1554_v4 = vmul.f32 %v2268_v34, %v1545_v1  ;;  %v1562_v8 = vadd.f32 %v2269_v44, %v1553_v50 }
 0xc02   :  { %v1555_v13 = vmul.f32 %v2268_v34, %v1546_v57  ;;  %v1563_v15 = vadd.f32 %v2269_v44, %v1554_v4  ;;  %v3427_v17 = vmul.f32 %v1562_v8, %v3010_v43 }
 0xc04   :  { %v1566_v18 = vmul.f32 %v1563_v15, %v3014_v51  ;;  %v1564_v19 = vadd.f32 %v2269_v44, %v1555_v13  ;;  %v1655_v11 = vpack.c.bf16 %v3427_v17, %v3427_v17 }
 0xc06   :  { %v1568_v20 = vpack.c.bf16 %v1566_v18, %v3427_v17  ;;  %v1567_v21 = vmul.f32 %v1564_v19, %v3012_v47  ;;  %v1925_v18 = vshrl.u32 %v370_v35, 7  ;;  %v2793_v35 = vmov -103.27893  }
 0xc08   :  { %2496 = vmatprep.mubr.msk.bf16.mxu0 %vm159_vm0, %v1568_v20  ;;  %v1569_v23 = vpack.c.bf16 %v1567_v21, %v1567_v21  ;;  %v2092_v19 = vsub.s32 1, %v1925_v18  ;;  %v1837_v20 = vld [vmem:[#allocation3] sm:$0x3]  ;;  %v1926_v21 = vsub.s32 0, %v1925_v18 }
 0xc0a   :  { %2497 = vmatmul.mubr.msk.bf16.vlgmr.msra.gmra.mrb[24].mxu0 %vm159_vm0, %v1569_v23  ;;  %v1836_v23 = vld [vmem:[#allocation6] sm:$0xff] }
 0xc0b   :  { %2501 = vmatpush3.bf16.msra.mxu0 %v2596_v22  ;;  %2504 = vmatprep.mubr.msk.bf16.mxu0 %vm2792_vm4, %v2791_v6  ;;  %v2093_v22 = vrot.slane %v1837_v20, %v2092_v19 }
 0xc0c   :  { %2502 = vmatprep.subr.bf16.mxu0 %v2791_v6 }
 0xc0f   :  { %2503 = vmatpush3.bf16.msra.mxu0 %v2597_v60  ;;  %v1927_v60 = vrot.slane %v1837_v20, %v1926_v21 }
 0xc10   :  { %2508 = vmatprep.subr.bf16.mxu0 %v2791_v6 }
 0xc12   :  { %2505 = vmatmul.mubr.msk.bf16.vlgmr.msra.gmra.mrb[28].mxu0 %vm159_vm0, %v1655_v11  ;;  %v2095_v11 = vmul.f32 %v2093_v22, %v3012_v47 }
 0xc13   :  { %2512 = vmatprep.mubr.msk.bf16.mxu0 %vm2792_vm4, %v2791_v6  ;;  %2509 = vmatpush3.bf16.msra.mxu0 %v2598_v12  ;;  %v1931_v12 = vrot.slane %v1836_v23, 6 }
 0xc14   :  { %2510 = vmatprep.subr.bf16.mxu0 %v2791_v6 }
 0xc17   :  { %2511 = vmatpush3.bf16.msra.mxu0 %v2599_v24  ;;  %v2094_v24 = vmul.f32 %v2093_v22, %v3014_v51 }
 0xc18   :  { %2516 = vmatprep.subr.bf16.mxu0 %v2791_v6 }
 0xcdd   :  { %v2498_v27 = vpop.f32.mrb[24].mxu0 }
 0xcde   :  { %v1642_v7 = vadd.f32 %v2498_v27, %v2270_v26  ;;  %v1633_v14 = vpop.f32.mrb[25].mxu0  ;;  %v1929_v27 = vmul.f32 %v1927_v60, %v3014_v51 }
 0xcdf   :  { %v1634_v29 = vadd.f32 %v2270_v26, %v1633_v14  ;;  %v2499_v37 = vpop.f32.mrb[26].mxu0  ;;  %v2097_v14 = vmul.f32 %v2095_v11, %v1931_v12 }
 0xce0   :  { %v1649_v41 = vmul.f32 %v1642_v7, %v3012_v47  ;;  %v1636_v48 = vpop.f32.mrb[27].mxu0  ;;  %v2096_v7 = vmul.f32 %v2094_v24, %v1931_v12  ;;  %v1934_v37 = vmul.f32 %v1931_v12, %v1929_v27 }
 0xce1   :  { %v1647_v16 = vmul.f32 %v1634_v29, %v3010_v43  ;;  %v1637_v52 = vadd.f32 %v2270_v26, %v1636_v48  ;;  %v1928_v26 = vmul.f32 %v1927_v60, %v3010_v43  ;;  %vm2099_vm8 = vcmp.gt.f32.partialorder %v2097_v14, 0.5 }
 0xce2   :  { %1654 = vst.msk [vmem:[%s3594_s28 + $0x10] sm:$0x3] %vm1653_vm5, %v1649_v41  ;;  %vm2098_vm7 = vcmp.gt.f32.partialorder %v2096_v7, 0.5  ;;  %vm1936_vm10 = vcmp.gt.f32.partialorder %v1934_v37, 0.5  ;;  %v2101_v48 = vsel %vm2099_vm8, 0.0, %v2793_v35  ;;  %vm1989_vm5 = vcmask 516096  }
 0xce3   :  { %1651 = vst.msk [vmem:[%s3594_s28] sm:$0xff] %vm1650_vm6, %v1647_v16  ;;  %v1648_v54 = vmul.f32 %v1637_v52, %v3014_v51  ;;  %v1933_v29 = vmul.f32 %v1931_v12, %v1928_v26  ;;  %v1938_v47 = vsel %vm1936_vm10, 0.0, %v2793_v35 }
 0xce5   :  { %1652 = vst.msk [vmem:[%s3594_s28 + $0x8] sm:$0xff] %vm1650_vm6, %v1648_v54  ;;  %v1716_v56 = vpop.f32.mrb[28].mxu0  ;;  %v2004_v39 = vpack.c.bf16 %v1649_v41, %v1648_v54  ;;  %v1838_v58 = vpack.c.bf16 %v1648_v54, %v1647_v16  ;;  %vm1935_vm9 = vcmp.gt.f32.partialorder %v1933_v29, 0.5  ;;  %v2100_v41 = vsel %vm2098_vm7, 0.0, %v2793_v35  ;;  %s2794_s28 = smov 16  }
 0xce6   :  { %v1717_v46 = vadd.f32 %v2275_v55, %v1716_v56  ;;  %v2506_v59 = vpop.f32.mrb[29].mxu0  ;;  %v1937_v16 = vsel %vm1935_vm9, 0.0, %v2793_v35  ;;  %v2104_v54 = vrot.slane %v2100_v41, 2  ;;  %v2105_v55 = vrot.slane %v2101_v48, 2 }
 0xce7   :  { %v1719_v62 = vpop.f32.mrb[30].mxu0  ;;  %v2006_v63 = vrot.slane %v2004_v39, 1  ;;  %v1840_v28 = vrot.slane %v1838_v58, 1  ;;  %v1942_v39 = vrot.slane %v1937_v16, 2  ;;  %v1943_v58 = vrot.slane %v1938_v47, 2 }
 0xce8   :  { %v1722_v38 = vmul.f32 %v1717_v46, %v1717_v46  ;;  %v2507_v0 = vpop.f32.mrb[31].mxu0  ;;  %v2106_v62 = vsel %vm1941_vm11, %v2104_v54, %v2105_v55 }
 0xce9   :  { %2007 = vrot.lane.b32.xlu0 %v2006_v63, %s2789_s9  ;;  %1841 = vrot.lane.b32.xlu1 %v1840_v28, %s2789_s9  ;;  %s2795_s9 = smov 8  }
 0xcea   :  { %v1723_v2 = vmul.f32 %v1722_v38, %v1717_v46 }
 0xcec   :  { %v1724_v3 = vmul.f32 0.044715, %v1723_v2 }
 0xcee   :  { %v1725_v25 = vadd.f32 %v1724_v3, %v1717_v46 }
 0xcf0   :  { %v1726_v5 = vmul.f32 0.7978846, %v1725_v25 }
 0xcf2   :  { %2678 = vtanh.f32 %v1726_v5 }
 0xcfc   :  { %v2679_v33 = vpop.eup %2678 }
 0xcfd   :  { %v1728_v36 = vadd.f32 1.0, %v2679_v33 }
 0xcff   :  { %v1729_v45 = vmul.f32 0.5, %v1728_v36 }
 0xd01   :  { %v1730_v31 = vmul.f32 %v1729_v45, %v1717_v46 }
 0xd03   :  { %v1731_v49 = vpack.c.bf16 %v1730_v31, %v1730_v31 }
 0xd05   :  { %2513 = vmatmul.mubr.msk.bf16.vlgmr.msra.gmra.mrb[32].mxu0 %vm159_vm0, %v1731_v49 }
 0xd06   :  { %2518 = vmatprep.mubr.msk.bf16.mxu0 %vm2792_vm4, %v2791_v6  ;;  %vm1987_vm4 = vcmask 457728  }
 0xd5b   :  { %v2008_v53 = vpop.permute.xlu0 %2007  ;;  %v1842_v9 = vpop.permute.xlu1 %1841 }
 0xd5c   :  { %v2013_v32 = vsel %vm159_vm0, %v2008_v53, 0  ;;  %v1847_v30 = vsel %vm159_vm0, %v1842_v9, 0 }
 0xd5d   :  { %2517 = vmatpush3.bf16.xpose.msra.mxu0 %v1847_v30  ;;  %2523 = vmatpush3.bf16.xpose.msra.mxu1 %v2013_v32 }
 0xd64   :  { %2519 = vmatmul.mubr.msk.bf16.vlgmr.msra.gmra.mrb[36].mxu0 %vm159_vm0, %v1840_v28  ;;  %2525 = vmatmul.mubr.msk.bf16.vlgmr.msra.gmra.mrb[20].mxu1 %vm159_vm0, %v2006_v63  ;;  %v1944_v28 = vsel %vm1941_vm11, %v1942_v39, %v1943_v58 }
 0xdd8   :  { %v3486_v40 = vpop.f32.mrb[32].mxu0 }
 0xdd9   :  { %v2514_v34 = vpop.f32.mrb[33].mxu0 }
 0xdda   :  { %v1797_v42 = vpop.f32.mrb[34].mxu0  ;;  %v2284_v34 = vld [vmem:[%s3587_s21 + $0x1] ss:$0 sm:$0xff] }
 0xddb   :  { %v2515_v10 = vpop.f32.mrb[35].mxu0  ;;  %v1795_v42 = vadd.f32 %v2284_v34, %v3486_v40 }
 0xddd   :  { %v1800_v10 = vmul.f32 %v1795_v42, %v1795_v42 }
 0xe37   :  { %v1883_v44 = vpop.f32.mrb[36].mxu0  ;;  %v2049_v50 = vpop.f32.mrb[20].mxu1 }
 0xe38   :  { %v1889_v6 = vmul.f32 0.03125, %v1883_v44  ;;  %v2055_v1 = vmul.f32 0.03125, %v2049_v50  ;;  %v2520_v61 = vpop.f32.mrb[37].mxu0  ;;  %v2526_v57 = vpop.f32.mrb[21].mxu1  ;;  %v1801_v44 = vmul.f32 %v1800_v10, %v1795_v42 }
 0xe39   :  { %v1886_v4 = vpop.f32.mrb[38].mxu0  ;;  %v2052_v8 = vpop.f32.mrb[22].mxu1 }
 0xe3a   :  { %v2527_v13 = vpop.f32.mrb[23].mxu1  ;;  %2056 = vxpose.xlu1.b32.start.end [1/1] (short) (narrow) %v2055_v1, 8  ;;  %1890 = vxpose.xlu0.b32.start.end [1/1] (short) (narrow) %v1889_v6, 8  ;;  %v2521_v15 = vpop.f32.mrb[39].mxu0  ;;  %v1802_v50 = vmul.f32 0.044715, %v1801_v44 }
 0xeba   :  { %v1906_v52 = vpop.trf.xlu0  ;;  %v2072_v56 = vpop.trf.xlu1 }
 0xebb   :  { %v1922_v43 = vadd.f32 %v1906_v52, %v1889_v6  ;;  %v2088_v51 = vadd.f32 %v2072_v56, %v2055_v1  ;;  %v1803_v6 = vadd.f32 %v1802_v50, %v1795_v42  ;;  %v2288_v56 = vld [vmem:[%s3588_s22] ss:$0 sm:$0xff]  ;;  %s2801_s22 = smov [#allocation9]  }
 0xebc   :  { %s2180_s19 = sshll.u32 %s2801_s22, 4  ;;  %s2181_s19 = int_to_ptr.vmem [resolvable:$true] %s2180_s19 }
 0xebd   :  { %v1923_v46 = vmul.f32 0.5, %v1922_v43  ;;  %v2089_v59 = vmul.f32 0.5, %v2088_v51  ;;  %v1804_v1 = vmul.f32 0.7978846, %v1803_v6  ;;  %s2734_s3 = scalar_lea.vmem %s2181_s19, 32  ;;  %p2739_p3 = scmp.lt.s32.totalorder %s2181_s19, %s2181_s19 }
 0xebe   :  { %p2735_p2 = scmp.ne.s32.totalorder %s2181_s19, %s2734_s3  ;;  %p2740_p4 = scmp.lt.s32.totalorder %s2734_s3, %s2734_s3 }
 0xebf   :  { %v2108_v63 = vadd.f32 %v2106_v62, %v2089_v59  ;;  %v3493_v38 = vadd.f32 %v1944_v28, %v1923_v46  ;;  %2680 = vtanh.f32 %v1804_v1 }
 0xec0   :  { %p2741_p5 = por %p2740_p4, %p2739_p3 }
 0xec1   :  { %v2114_v0 = vrot.slane %v2108_v63, 2  ;;  %v2110_v2 = vrot.slane %v2108_v63, 1  ;;  %v1948_v3 = vrot.slane %v3493_v38, 1  ;;  %v2118_v25 = vrot.slane %v2108_v63, 3 }
 0xec2   :  { %v1952_v5 = vrot.slane %v3493_v38, 2  ;;  %v2122_v33 = vrot.slane %v2108_v63, 4  ;;  %v1956_v36 = vrot.slane %v3493_v38, 3  ;;  %v2126_v45 = vrot.slane %v2108_v63, 5  ;;  %p2742_p6 = pnand %p2741_p5, %p2735_p2 }
 0xec3   :  { %2115 = vrot.lane.b32.xlu1 %v2114_v0, %s2794_s28  ;;  %2111 = vrot.lane.b32.xlu0 %v2110_v2, %s2795_s9  ;;  %v1960_v31 = vrot.slane %v3493_v38, 4  ;;  %v2130_v49 = vrot.slane %v2108_v63, 6  ;;  %v1964_v53 = vrot.slane %v3493_v38, 5  ;;  %v2134_v9 = vrot.slane %v2108_v63, 7 }
 0xec4   :  { %v1968_v32 = vrot.slane %v3493_v38, 6  ;;  %v1972_v30 = vrot.slane %v3493_v38, 7 }
 0xec7   :  { %1949 = vrot.lane.b32.xlu1 %v1948_v3, %s2795_s9  ;;  %2119 = vrot.lane.b32.xlu0 %v2118_v25, %s2796_s1 }
 0xec9   :  { %v2681_v18 = vpop.eup %2680 }
 0xeca   :  { %v1806_v40 = vadd.f32 1.0, %v2681_v18 }
 0xecb   :  { %1953 = vrot.lane.b32.xlu1 %v1952_v5, %s2794_s28  ;;  %2123 = vrot.lane.b32.xlu0 %v2122_v33, %s2797_s8  ;;  %v2289_v33 = vld [vmem:[#allocation2] ss:$0 sm:$0xff] }
 0xecc   :  { %v1807_v26 = vmul.f32 0.5, %v1806_v40 }
 0xece   :  { %v1808_v47 = vmul.f32 %v1807_v26, %v1795_v42 }
 0xecf   :  { %1957 = vrot.lane.b32.xlu1 %v1956_v36, %s2796_s1  ;;  %2127 = vrot.lane.b32.xlu0 %v2126_v45, %s2798_s5 }
 0xed0   :  { %v1816_v58 = vmul.f32 %v2288_v56, %v1808_v47 }
 0xed2   :  { %v1817_v46 = vsel %vm1220_vm3, %v1816_v58, 0.0  ;;  %vm1833_vm3 = vcmask 269312  }
 0xed3   :  { %1961 = vrot.lane.b32.xlu1 %v1960_v31, %s2797_s8  ;;  %2131 = vrot.lane.b32.xlu0 %v2130_v49, %s2799_s24 }
 0xed7   :  { %1965 = vrot.lane.b32.xlu1 %v1964_v53, %s2798_s5  ;;  %2135 = vrot.lane.b32.xlu0 %v2134_v9, %s2800_s10 }
 0xedb   :  { %1969 = vrot.lane.b32.xlu1 %v1968_v32, %s2799_s24  ;;  %1973 = vrot.lane.b32.xlu0 %v1972_v30, %s2800_s10 }
 0xf35   :  { %v2116_v61 = vpop.permute.xlu1 %2115  ;;  %v2112_v57 = vpop.permute.xlu0 %2111 }
 0xf36   :  { %v2138_v21 = vsel %vm1976_vm12, %v2108_v63, %v2112_v57 }
 0xf37   :  { %v2139_v22 = vsel %vm1978_vm13, %v2138_v21, %v2116_v61 }
 0xf39   :  { %v1950_v4 = vpop.permute.xlu1 %1949  ;;  %v2120_v8 = vpop.permute.xlu0 %2119 }
 0xf3a   :  { %v2140_v11 = vsel %vm1980_vm15, %v2139_v22, %v2120_v8  ;;  %v1977_v27 = vsel %vm1976_vm12, %v3493_v38, %v1950_v4 }
 0xf3d   :  { %v1954_v13 = vpop.permute.xlu1 %1953  ;;  %v2124_v15 = vpop.permute.xlu0 %2123 }
 0xf3e   :  { %v2141_v12 = vsel %vm159_vm0, %v2140_v11, %v2124_v15  ;;  %v1979_v37 = vsel %vm1978_vm13, %v1977_v27, %v1954_v13 }
 0xf41   :  { %v1958_v19 = vpop.permute.xlu1 %1957  ;;  %v2128_v20 = vpop.permute.xlu0 %2127 }
 0xf42   :  { %v2142_v24 = vsel %vm1983_vm1, %v2141_v12, %v2128_v20  ;;  %v1981_v41 = vsel %vm1980_vm15, %v1979_v37, %v1958_v19 }
 0xf45   :  { %v1962_v23 = vpop.permute.xlu1 %1961  ;;  %v2132_v60 = vpop.permute.xlu0 %2131 }
 0xf46   :  { %v2143_v7 = vsel %vm1985_vm2, %v2142_v24, %v2132_v60  ;;  %v1982_v16 = vsel %vm159_vm0, %v1981_v41, %v1962_v23 }
 0xf49   :  { %v1966_v14 = vpop.permute.xlu1 %1965  ;;  %v2136_v29 = vpop.permute.xlu0 %2135 }
 0xf4a   :  { %v3518_v35 = vsel %vm1987_vm4, %v2143_v7, %v2136_v29  ;;  %v1984_v52 = vsel %vm1983_vm1, %v1982_v16, %v1966_v14 }
 0xf4b   :  { %v2145_v48 = vsel %vm1989_vm5, %v3518_v35, -inf }
 0xf4c   :  { %2146 = vmax.xlane.f32.xlu1 %v2145_v48 }
 0xf4d   :  { %v1970_v54 = vpop.permute.xlu1 %1969  ;;  %v1974_v55 = vpop.permute.xlu0 %1973 }
 0xf4e   :  { %v1986_v43 = vsel %vm1985_vm2, %v1984_v52, %v1970_v54 }
 0xf4f   :  { %v1988_v51 = vsel %vm1987_vm4, %v1986_v43, %v1974_v55 }
 0xf50   :  { %v1990_v39 = vsel %vm1989_vm5, %v1988_v51, -inf }
 0xf51   :  { %1991 = vmax.xlane.f32.xlu0 %v1990_v39 }
 0xf55   :  { %1818 = vadd.xlane.f32.xlu0 %v1817_v46 }
 0xfd9   :  { %v2147_v59 = vpop.xlane.xlu1 %2146 }
 0xfda   :  { %v2148_v62 = vsub.f32 %v3518_v35, %v2147_v59 }
 0xfdc   :  { %v2149_v63 = vmul.f32 1.442695, %v2148_v62 }
 0xfde   :  { %2682 = vpow2.f32 %v2149_v63  ;;  %v1992_v28 = vpop.xlane.xlu0 %1991 }
 0xfdf   :  { %v1993_v38 = vsub.f32 %v1988_v51, %v1992_v28 }
 0xfe1   :  { %v1994_v0 = vmul.f32 1.442695, %v1993_v38 }
 0xfe2   :  { %v1819_v36 = vpop.xlane.xlu0 %1818 }
 0xfe3   :  { %2684 = vpow2.f32 %v1994_v0  ;;  %v1827_v45 = vadd.f32 %v2289_v33, %v1819_v36 }
 0xfe8   :  { %v2683_v2 = vpop.eup %2682 }
 0xfe9   :  { %v2151_v3 = vsel %vm1989_vm5, %v2683_v2, 0.0 }
 0xfea   :  { %2152 = vadd.xlane.f32.xlu1 %v2151_v3 }
 0xfed   :  { %v2685_v25 = vpop.eup %2684 }
 0xfee   :  { %v1996_v5 = vsel %vm1989_vm5, %v2685_v25, 0.0 }
 0xfef   :  { %1997 = vadd.xlane.f32.xlu0 %v1996_v5 }
 0xffb   :  { %1829 = vrot.lane.b32.xlu1 %v1827_v45, %s2797_s8 }
0x1077   :  { %v2153_v31 = vpop.xlane.xlu1 %2152 }
0x1078   :  { %2686 = vlog2.f32 %v2153_v31 }
0x107b   :  { %v1830_v49 = vpop.permute.xlu1 %1829 }
0x107c   :  { %v1832_v53 = vsel %vm159_vm0, %v3427_v17, %v1830_v49  ;;  %v1998_v9 = vpop.xlane.xlu0 %1997 }
0x107d   :  { %2688 = vlog2.f32 %v1998_v9  ;;  %v1834_v32 = vsel %vm1833_vm3, %v1832_v53, 0.0 }
0x107e   :  { %1835 = vst [vmem:[#allocation9] sm:$0x3] %v1834_v32 }
0x107f   :  { %2745 = shalt.err (!%p2742_p6)
}
0x1080   :  { %s2746_s29 = scalar_lea.hbm %s3593_s27, 32 }
0x1081   :  { %p2747_p7 = scmp.ne.s32.totalorder %s3593_s27, %s2746_s29  ;;  %p2750_p8 = scmp.lt.u32.totalorder %s2746_s29, %s3593_s27 }
0x1083   :  { %p2752_p9 = pnand %p2750_p8, %p2747_p7 }
0x1085   :  { %2755 = shalt.err (!%p2752_p9)
}
0x1086   :  { %2183 = dma.vmem_to_hbm [thread:$0]  %s2181_s19, 32, %s3593_s27, [#allocation10]   ;;  %v2687_v17 = vpop.eup %2686 }
0x1087   :  { %v2155_v30 = vmul.f32 0.6931472, %v2687_v17  ;;  %v2689_v42 = vpop.eup %2688  ;;  %s2802_s12 = smov [#allocation8]  }
0x1088   :  { %v2000_v44 = vmul.f32 0.6931472, %v2689_v42  ;;  %s2170_s25 = sshll.u32 %s2802_s12, 4  ;;  %s2171_s25 = int_to_ptr.vmem [resolvable:$true] %s2170_s25 }
0x1089   :  { %v2156_v34 = vadd.f32 %v2155_v30, %v2147_v59  ;;  %s2756_s27 = scalar_lea.vmem %s2171_s25, 32  ;;  %p2761_p11 = scmp.lt.s32.totalorder %s2171_s25, %s2171_s25 }
0x108a   :  { %v2001_v50 = vadd.f32 %v2000_v44, %v1992_v28  ;;  %p2757_p10 = scmp.ne.s32.totalorder %s2171_s25, %s2756_s27  ;;  %p2762_p12 = scmp.lt.s32.totalorder %s2756_s27, %s2756_s27 }
0x108b   :  { %v2157_v10 = vsub.f32 %v3518_v35, %v2156_v34 }
0x108c   :  { %v2002_v1 = vsub.f32 %v1988_v51, %v2001_v50  ;;  %p2763_p13 = por %p2762_p12, %p2761_p11 }
0x108d   :  { %v2158_v6 = vsel %vm1650_vm6, %v2157_v10, 0.0 }
0x108e   :  { %v2160_v61 = vrot.slane %v2158_v6, 7  ;;  %v2003_v57 = vsel %vm1650_vm6, %v2002_v1, 0.0  ;;  %p2764_p0 = pnand %p2763_p13, %p2757_p10 }
0x1090   :  { %v2162_v4 = vsel %vm699_vm14, %v2003_v57, %v2160_v61 }
0x1091   :  { %2163 = vst [vmem:[#allocation8] sm:$0x3] %v2162_v4 }
0x1092   :  { %2767 = shalt.err (!%p2764_p0)
}
0x1093   :  { %s2768_s16 = scalar_lea.hbm %s3592_s26, 32 }
0x1094   :  { %p2769_p1 = scmp.ne.s32.totalorder %s3592_s26, %s2768_s16  ;;  %p2772_p2 = scmp.lt.u32.totalorder %s2768_s16, %s3592_s26 }
0x1096   :  { %p2774_p3 = pnand %p2772_p2, %p2769_p1 }
0x1098   :  { %2777 = shalt.err (!%p2774_p3)
}
0x1099   :  { %2173 = dma.vmem_to_hbm [thread:$0]  %s2171_s25, 32, %s3592_s26, [#allocation5]  }
0x109a   :  { %2782 = dma.done.wait [#allocation5], 32  }
0x109b   :  { %2783 = vsyncadd [#allocation5], 4294967264 }
0x109c   :  { %2784 = dma.done.wait [#allocation10], 32  }
0x109d   :  { %2785 = vsyncadd [#allocation10], 4294967264 }
0x109e   :  { %2194 = vsyncpa [#allocation4], 1 }
0x109f   :  { %2195 = vsyncpa [#allocation7], 1 }
0x10a0   :  { %2196 = vsyncpa [#allocation5], 1 }
0x10a1   :  { %2197 = vsyncpa [#allocation10], 1 }

</bundles_post_ra>
